<compile_context>
chip_gen: v7x
topology: tpu7x:2x2x1
jax: 0.10.0
libtpu: 0.0.40
codegen_flags: <defaults>
</compile_context>

<pallas_src>
import functools
import numpy as np
import jax
import jax.numpy as jnp
from jax.experimental import pallas as pl
from jax.experimental.pallas import tpu as pltpu


# ----------------------------------------------------------------------------
# In-kernel helpers
# ----------------------------------------------------------------------------
def _layer_norm(x, gamma, beta, eps=1e-5):
    mu = jnp.mean(x, axis=-1, keepdims=True)
    var = jnp.mean((x - mu) ** 2, axis=-1, keepdims=True)
    return (x - mu) * jax.lax.rsqrt(var + eps) * gamma + beta


# ----------------------------------------------------------------------------
# Fused ViT forward kernel (one grid step = one batch element)
# ----------------------------------------------------------------------------
def _vit_fused_kernel(seq_ref, w_in_ref, add_ref,
                      wqkv_ref, bqkv_ref, wo_ref, bo_ref,
                      w1_ref, b1_ref, w2_ref, b2_ref,
                      ln1g_ref, ln1b_ref, ln2g_ref, ln2b_ref,
                      lng_ref, lnb_ref, whead_ref, bhead_ref,
                      out_ref, *, nhead, num_layers, s_real, s_pad):
    D = w_in_ref.shape[1]
    hd = D // nhead
    scale = float(hd) ** -0.5

    # Input mapping + cls token + positional embedding.
    # `add_ref` already contains [cls+pos0 ; b_in+pos[1:S] ; 0-pad] so padded
    # rows come out exactly zero and row 0 is the cls token.
    h = (jnp.dot(seq_ref[0], w_in_ref[...], preferred_element_type=jnp.float32)
         + add_ref[...])                                      # (s_pad, D)

    # Key mask for the padded sequence positions.
    col = jax.lax.broadcasted_iota(jnp.int32, (1, 1, s_pad), 2)
    key_mask = col < s_real                                   # (1, 1, s_pad)

    for l in range(num_layers):                               # unrolled (small)
        # ---- multi-head self attention -----------------------------------
        qkv = (jnp.dot(h, wqkv_ref[l], preferred_element_type=jnp.float32)
               + bqkv_ref[l])                                 # (s_pad, 3D)
        q3 = jnp.stack([qkv[:, hh * hd:(hh + 1) * hd]
                        for hh in range(nhead)], axis=0)      # (nh, s_pad, hd)
        k3 = jnp.stack([qkv[:, D + hh * hd:D + (hh + 1) * hd]
                        for hh in range(nhead)], axis=0)
        v3 = jnp.stack([qkv[:, 2 * D + hh * hd:2 * D + (hh + 1) * hd]
                        for hh in range(nhead)], axis=0)

        s = jnp.einsum("hqd,hkd->hqk", q3, k3,
                       preferred_element_type=jnp.float32) * scale
        s = jnp.where(key_mask, s, -1e30)
        s = s - jnp.max(s, axis=-1, keepdims=True)
        p = jnp.exp(s)
        p = p * pl.reciprocal(jnp.sum(p, axis=-1, keepdims=True), approx=True)
        ctx3 = jnp.einsum("hqk,hkd->hqd", p, v3,
                          preferred_element_type=jnp.float32)  # (nh, s_pad, hd)
        ctx = jnp.concatenate([ctx3[hh] for hh in range(nhead)], axis=-1)

        attn = (jnp.dot(ctx, wo_ref[l], preferred_element_type=jnp.float32)
                + bo_ref[l])
        h = _layer_norm(h + attn, ln1g_ref[l], ln1b_ref[l])

        # ---- feed-forward --------------------------------------------------
        ff = jnp.maximum(
            jnp.dot(h, w1_ref[l], preferred_element_type=jnp.float32) + b1_ref[l],
            0.0)
        ff = jnp.dot(ff, w2_ref[l], preferred_element_type=jnp.float32) + b2_ref[l]
        h = _layer_norm(h + ff, ln2g_ref[l], ln2b_ref[l])

    # ---- final LN + classification head on [cls] ---------------------------
    y = _layer_norm(h[0:1, :], lng_ref[...], lnb_ref[...])    # (1, D)
    out_ref[0] = (jnp.dot(y, whead_ref[...], preferred_element_type=jnp.float32)
                  + bhead_ref[...])                           # (1, C_PAD)


# ----------------------------------------------------------------------------
# Glue (pure JAX): Video2Seq, positional embedding, parameters, forward
# ----------------------------------------------------------------------------
def trig_positional_embedding(src_len, d_model):
    emb = np.zeros((src_len, d_model), dtype=np.float32)
    pos = np.arange(src_len)
    for k in range(d_model // 2):
        omiga = np.power(10000, 2.0 * k / d_model)
        emb[:, 2 * k] = np.sin(pos / omiga)
        emb[:, 2 * k + 1] = np.cos(pos / omiga)
    return jnp.asarray(emb)


def video_to_seq(x, thw_clip):
    # Equivalent to the PyTorch Video2Seq loop (reshape + transpose).
    B, T, C, H, W = x.shape
    Tc, Hc, Wc = thw_clip
    Tp, Hp, Wp = T // Tc, H // Hc, W // Wc
    x = x.reshape(B, Tc, Tp, C, Hc, Hp, Wc, Wp)
    x = x.transpose(0, 1, 4, 6, 2, 3, 5, 7)       # (B, Tc, Hc, Wc, Tp, C, Hp, Wp)
    return x.reshape(B, Tc * Hc * Wc, Tp, C, Hp, Wp)


def init_params(key, *, patch_size, d_model, mlp_dim, num_layers, num_classes,
                max_src_len):
    def nxt():
        nonlocal key
        key, sub = jax.random.split(key)
        return sub

    std = 0.05
    nl, D, F = num_layers, d_model, mlp_dim
    return {
        "w_in": jax.random.normal(nxt(), (patch_size, D), jnp.float32) * std,
        "b_in": jax.random.normal(nxt(), (1, D), jnp.float32) * std,
        "cls_token": jax.random.normal(nxt(), (1, 1, D), jnp.float32),
        "pos_emb": trig_positional_embedding(max_src_len + 1, D),
        "ln_g": jnp.ones((1, D), jnp.float32),
        "ln_b": jnp.zeros((1, D), jnp.float32),
        "w_head": jax.random.normal(nxt(), (D, num_classes), jnp.float32) * std,
        "b_head": jnp.zeros((1, num_classes), jnp.float32),
        # stacked per-layer parameters (leading axis = layer)
        "wqkv": jax.random.normal(nxt(), (nl, D, 3 * D), jnp.float32) * std,
        "bqkv": jnp.zeros((nl, 1, 3 * D), jnp.float32),
        "wo": jax.random.normal(nxt(), (nl, D, D), jnp.float32) * std,
        "bo": jnp.zeros((nl, 1, D), jnp.float32),
        "w1": jax.random.normal(nxt(), (nl, D, F), jnp.float32) * std,
        "b1": jnp.zeros((nl, 1, F), jnp.float32),
        "w2": jax.random.normal(nxt(), (nl, F, D), jnp.float32) * std,
        "b2": jnp.zeros((nl, 1, D), jnp.float32),
        "ln1_g": jnp.ones((nl, 1, D), jnp.float32),
        "ln1_b": jnp.zeros((nl, 1, D), jnp.float32),
        "ln2_g": jnp.ones((nl, 1, D), jnp.float32),
        "ln2_b": jnp.zeros((nl, 1, D), jnp.float32),
    }


def vit_forward(params, x, thw_clip, nhead):
    B = x.shape[0]
    D = params["w_in"].shape[1]
    P = params["w_in"].shape[0]
    C = params["w_head"].shape[1]
    nl = params["wqkv"].shape[0]
    F = params["w1"].shape[2]

    patch_seq = video_to_seq(x, thw_clip)             # (B, L, Tp, C, Hp, Wp)
    L = patch_seq.shape[1]
    seq = patch_seq.reshape(B, L, P)                  # flatten(2); dropout = id
    S = L + 1
    S_PAD = ((S + 7) // 8) * 8                        # sublane-aligned (16)
    C_PAD = ((C + 127) // 128) * 128                  # lane-dense output (128)
    hd = D // nhead

    # Pad sequence: row 0 reserved for [cls], rows S..S_PAD are zero padding.
    seq_pad = jnp.pad(seq, ((0, 0), (1, S_PAD - S), (0, 0)))
    # Additive term folding input bias, cls token and positional embedding so
    # that in-kernel  h = seq_pad @ w_in + add  gives exactly
    # [cls+pos0 ; patches@w_in + b_in + pos[1:S] ; zeros].
    add = jnp.concatenate(
        [params["cls_token"][0] + params["pos_emb"][0:1],
         params["b_in"] + params["pos_emb"][1:S],
         jnp.zeros((S_PAD - S, D), jnp.float32)], axis=0)      # (S_PAD, D)
    w_head_pad = jnp.pad(params["w_head"], ((0, 0), (0, C_PAD - C)))
    b_head_pad = jnp.pad(params["b_head"], ((0, 0), (0, C_PAD - C)))

    kern = functools.partial(_vit_fused_kernel, nhead=nhead, num_layers=nl,
                             s_real=S, s_pad=S_PAD)

    flops = int(B * (2 * S_PAD * P * D
                     + nl * (2 * S_PAD * D * 3 * D
                             + 4 * nhead * S_PAD * S_PAD * hd
                             + 2 * S_PAD * D * D
                             + 4 * S_PAD * D * F)
                     + 2 * D * C_PAD))
    transcendentals = int(B * (nl * nhead * S_PAD * S_PAD + (2 * nl + 1) * S_PAD))
    bytes_accessed = int(4 * (B * S_PAD * P + P * D + S_PAD * D
                              + nl * (3 * D * D + 3 * D + D * D + D
                                      + 2 * D * F + F + 5 * D)
                              + 2 * D + D * C_PAD + C_PAD + B * C_PAD))

    full = lambda *shape: shape  # helper for readability below
    zeros2 = lambda b: (0, 0)
    zeros3 = lambda b: (0, 0, 0)

    out_pad = pl.pallas_call(
        kern,
        out_shape=jax.ShapeDtypeStruct((B, 1, C_PAD), jnp.float32),
        grid=(B,),
        in_specs=[
            pl.BlockSpec((1, S_PAD, P), lambda b: (b, 0, 0)),   # seq_pad
            pl.BlockSpec(full(P, D), zeros2),                   # w_in
            pl.BlockSpec(full(S_PAD, D), zeros2),               # add
            pl.BlockSpec(full(nl, D, 3 * D), zeros3),           # wqkv
            pl.BlockSpec(full(nl, 1, 3 * D), zeros3),           # bqkv
            pl.BlockSpec(full(nl, D, D), zeros3),               # wo
            pl.BlockSpec(full(nl, 1, D), zeros3),               # bo
            pl.BlockSpec(full(nl, D, F), zeros3),               # w1
            pl.BlockSpec(full(nl, 1, F), zeros3),               # b1
            pl.BlockSpec(full(nl, F, D), zeros3),               # w2
            pl.BlockSpec(full(nl, 1, D), zeros3),               # b2
            pl.BlockSpec(full(nl, 1, D), zeros3),               # ln1_g
            pl.BlockSpec(full(nl, 1, D), zeros3),               # ln1_b
            pl.BlockSpec(full(nl, 1, D), zeros3),               # ln2_g
            pl.BlockSpec(full(nl, 1, D), zeros3),               # ln2_b
            pl.BlockSpec(full(1, D), zeros2),                   # ln_g
            pl.BlockSpec(full(1, D), zeros2),                   # ln_b
            pl.BlockSpec(full(D, C_PAD), zeros2),               # w_head (padded)
            pl.BlockSpec(full(1, C_PAD), zeros2),               # b_head (padded)
        ],
        out_specs=pl.BlockSpec((1, 1, C_PAD), lambda b: (b, 0, 0)),
        compiler_params=pltpu.CompilerParams(
            dimension_semantics=("parallel",)),
        cost_estimate=pl.CostEstimate(flops=flops,
                                      transcendentals=transcendentals,
                                      bytes_accessed=bytes_accessed),
    )(seq_pad, params["w_in"], add,
      params["wqkv"], params["bqkv"], params["wo"], params["bo"],
      params["w1"], params["b1"], params["w2"], params["b2"],
      params["ln1_g"], params["ln1_b"], params["ln2_g"], params["ln2_b"],
      params["ln_g"], params["ln_b"], w_head_pad, b_head_pad)

    return out_pad[:, 0, :C]


# ----------------------------------------------------------------------------
# Pure-JAX reference (for correctness check)
# ----------------------------------------------------------------------------
def _ref_ln(x, g, b, eps=1e-5):
    mu = x.mean(-1, keepdims=True)
    var = ((x - mu) ** 2).mean(-1, keepdims=True)
    return (x - mu) / jnp.sqrt(var + eps) * g + b


def ref_forward(params, x, thw_clip, nhead):
    B = x.shape[0]
    D = params["w_in"].shape[1]
    seq = video_to_seq(x, thw_clip)
    L = seq.shape[1]
    seq = seq.reshape(B, L, -1)
    h = seq @ params["w_in"] + params["b_in"]
    h = jnp.concatenate(
        [jnp.broadcast_to(params["cls_token"], (B, 1, D)), h], axis=1)
    h = h + params["pos_emb"][:L + 1][None]
    hd = D // nhead
    S = L + 1
    nl = params["wqkv"].shape[0]
    for l in range(nl):
        qkv = h @ params["wqkv"][l] + params["bqkv"][l]
        q, k, v = qkv[..., :D], qkv[..., D:2 * D], qkv[..., 2 * D:]
        sp = lambda t: t.reshape(B, S, nhead, hd).transpose(0, 2, 1, 3)
        q, k, v = sp(q), sp(k), sp(v)
        s = jnp.einsum("bhqd,bhkd->bhqk", q, k) / np.sqrt(hd)
        p = jax.nn.softmax(s, axis=-1)
        ctx = jnp.einsum("bhqk,bhkd->bhqd", p, v).transpose(0, 2, 1, 3).reshape(B, S, D)
        h = _ref_ln(h + ctx @ params["wo"][l] + params["bo"][l],
                    params["ln1_g"][l], params["ln1_b"][l])
        ff = jnp.maximum(h @ params["w1"][l] + params["b1"][l], 0.0) \
            @ params["w2"][l] + params["b2"][l]
        h = _ref_ln(h + ff, params["ln2_g"][l], params["ln2_b"][l])
    y = _ref_ln(h[:, 0, :], params["ln_g"], params["ln_b"])
    return y @ params["w_head"] + params["b_head"]


# ----------------------------------------------------------------------------
if __name__ == "__main__":
    input_THW = (4, 8, 8)        # (T, H, W)
    THW_clip = (2, 2, 2)
    d_model = 32
    nhead = 4
    mlp_dim = 64
    num_layers = 2
    num_classes = 10
    batch = 2
    max_src_len = THW_clip[0] * THW_clip[1] * THW_clip[2]            # 8
    patch_size = ((input_THW[0] // THW_clip[0])
                  * (input_THW[1] // THW_clip[1])
                  * (input_THW[2] // THW_clip[2]) * 3)               # 96 (C=3)

    key = jax.random.PRNGKey(0)
    pkey, xkey = jax.random.split(key)
    params = init_params(
        pkey, patch_size=patch_size, d_model=d_model, mlp_dim=mlp_dim,
        num_layers=num_layers, num_classes=num_classes, max_src_len=max_src_len,
    )
    x = jax.random.normal(
        xkey, (batch, input_THW[0], 3, input_THW[1], input_THW[2]), jnp.float32
    )

    out = vit_forward(params, x, THW_clip, nhead)
    out = jax.block_until_ready(out)

    ref = ref_forward(params, x, THW_clip, nhead)
    assert out.shape == (batch, num_classes)
    assert bool(jnp.all(jnp.isfinite(out)))
    assert bool(jnp.allclose(out, ref, atol=5e-2, rtol=5e-2)), (out, ref)
    print("KERNEL_OK")
</pallas_src>

<mosaic_0001>
module attributes {stable_mosaic.version = 11 : i64} {
  func.func @_vit_fused_kernel(%arg0: i32, %arg1: memref<1x16x96xf32, #tpu.memory_space<vmem>>, %arg2: memref<96x32xf32, #tpu.memory_space<vmem>>, %arg3: memref<16x32xf32, #tpu.memory_space<vmem>>, %arg4: memref<2x32x96xf32, #tpu.memory_space<vmem>>, %arg5: memref<2x1x96xf32, #tpu.memory_space<vmem>>, %arg6: memref<2x32x32xf32, #tpu.memory_space<vmem>>, %arg7: memref<2x1x32xf32, #tpu.memory_space<vmem>>, %arg8: memref<2x32x64xf32, #tpu.memory_space<vmem>>, %arg9: memref<2x1x64xf32, #tpu.memory_space<vmem>>, %arg10: memref<2x64x32xf32, #tpu.memory_space<vmem>>, %arg11: memref<2x1x32xf32, #tpu.memory_space<vmem>>, %arg12: memref<2x1x32xf32, #tpu.memory_space<vmem>>, %arg13: memref<2x1x32xf32, #tpu.memory_space<vmem>>, %arg14: memref<2x1x32xf32, #tpu.memory_space<vmem>>, %arg15: memref<2x1x32xf32, #tpu.memory_space<vmem>>, %arg16: memref<1x32xf32, #tpu.memory_space<vmem>>, %arg17: memref<1x32xf32, #tpu.memory_space<vmem>>, %arg18: memref<32x128xf32, #tpu.memory_space<vmem>>, %arg19: memref<1x128xf32, #tpu.memory_space<vmem>>, %arg20: memref<1x1x128xf32, #tpu.memory_space<vmem>>) attributes {dimension_semantics = [#tpu.dimension_semantics<parallel>], iteration_bounds = array<i64: 2>, scalar_prefetch = 0 : i64, scratch_operands = 0 : i64, tpu.core_type = #tpu.core_type<tc>, window_params = [{transform_indices = @transform_0, window_bounds = array<i64: 1, 16, 96>}, {pipeline_mode = #tpu.pipeline_mode<synchronous>, transform_indices = @transform_1, window_bounds = array<i64: 96, 32>}, {pipeline_mode = #tpu.pipeline_mode<synchronous>, transform_indices = @transform_2, window_bounds = array<i64: 16, 32>}, {pipeline_mode = #tpu.pipeline_mode<synchronous>, transform_indices = @transform_3, window_bounds = array<i64: 2, 32, 96>}, {pipeline_mode = #tpu.pipeline_mode<synchronous>, transform_indices = @transform_4, window_bounds = array<i64: 2, 1, 96>}, {pipeline_mode = #tpu.pipeline_mode<synchronous>, transform_indices = @transform_5, window_bounds = array<i64: 2, 32, 32>}, {pipeline_mode = #tpu.pipeline_mode<synchronous>, transform_indices = @transform_6, window_bounds = array<i64: 2, 1, 32>}, {pipeline_mode = #tpu.pipeline_mode<synchronous>, transform_indices = @transform_7, window_bounds = array<i64: 2, 32, 64>}, {pipeline_mode = #tpu.pipeline_mode<synchronous>, transform_indices = @transform_8, window_bounds = array<i64: 2, 1, 64>}, {pipeline_mode = #tpu.pipeline_mode<synchronous>, transform_indices = @transform_9, window_bounds = array<i64: 2, 64, 32>}, {pipeline_mode = #tpu.pipeline_mode<synchronous>, transform_indices = @transform_10, window_bounds = array<i64: 2, 1, 32>}, {pipeline_mode = #tpu.pipeline_mode<synchronous>, transform_indices = @transform_11, window_bounds = array<i64: 2, 1, 32>}, {pipeline_mode = #tpu.pipeline_mode<synchronous>, transform_indices = @transform_12, window_bounds = array<i64: 2, 1, 32>}, {pipeline_mode = #tpu.pipeline_mode<synchronous>, transform_indices = @transform_13, window_bounds = array<i64: 2, 1, 32>}, {pipeline_mode = #tpu.pipeline_mode<synchronous>, transform_indices = @transform_14, window_bounds = array<i64: 2, 1, 32>}, {pipeline_mode = #tpu.pipeline_mode<synchronous>, transform_indices = @transform_15, window_bounds = array<i64: 1, 32>}, {pipeline_mode = #tpu.pipeline_mode<synchronous>, transform_indices = @transform_16, window_bounds = array<i64: 1, 32>}, {pipeline_mode = #tpu.pipeline_mode<synchronous>, transform_indices = @transform_17, window_bounds = array<i64: 32, 128>}, {pipeline_mode = #tpu.pipeline_mode<synchronous>, transform_indices = @transform_18, window_bounds = array<i64: 1, 128>}, {transform_indices = @transform_19, window_bounds = array<i64: 1, 1, 128>}]} {
    %c0 = arith.constant 0 : index
    %c0_0 = arith.constant 0 : index
    %c0_1 = arith.constant 0 : index
    %0 = vector.load %arg1[%c0, %c0_0, %c0_1] : memref<1x16x96xf32, #tpu.memory_space<vmem>>, vector<1x16x96xf32>
    %1 = vector.shape_cast %0 : vector<1x16x96xf32> to vector<16x96xf32>
    %c0_2 = arith.constant 0 : index
    %c0_3 = arith.constant 0 : index
    %2 = vector.load %arg2[%c0_2, %c0_3] : memref<96x32xf32, #tpu.memory_space<vmem>>, vector<96x32xf32>
    %cst = arith.constant dense<0.000000e+00> : vector<16x32xf32>
    %3 = tpu.matmul %1, %2, %cst {dimension_numbers = #tpu.dot_dimension_numbers<[1], [0], [0], [1], [0, 0, 1, 1], [], []>} : vector<16x96xf32>, vector<96x32xf32>, vector<16x32xf32> -> vector<16x32xf32>
    %c0_4 = arith.constant 0 : index
    %c0_5 = arith.constant 0 : index
    %4 = vector.load %arg3[%c0_4, %c0_5] : memref<16x32xf32, #tpu.memory_space<vmem>>, vector<16x32xf32>
    %5 = arith.addf %3, %4 : vector<16x32xf32>
    %6 = tpu.iota {dimensions = array<i32: 2>} : vector<1x1x16xi32>
    %c9_i32 = arith.constant 9 : i32
    %7 = vector.broadcast %c9_i32 : i32 to vector<1x1x16xi32>
    %8 = arith.cmpi slt, %6, %7 : vector<1x1x16xi32>
    %c0_6 = arith.constant 0 : index
    %c0_7 = arith.constant 0 : index
    %c0_8 = arith.constant 0 : index
    %9 = vector.load %arg4[%c0_6, %c0_7, %c0_8] : memref<2x32x96xf32, #tpu.memory_space<vmem>>, vector<1x32x96xf32>
    %10 = vector.shape_cast %9 : vector<1x32x96xf32> to vector<32x96xf32>
    %cst_9 = arith.constant dense<0.000000e+00> : vector<16x96xf32>
    %11 = tpu.matmul %5, %10, %cst_9 {dimension_numbers = #tpu.dot_dimension_numbers<[1], [0], [0], [1], [0, 0, 1, 1], [], []>} : vector<16x32xf32>, vector<32x96xf32>, vector<16x96xf32> -> vector<16x96xf32>
    %c0_10 = arith.constant 0 : index
    %c0_11 = arith.constant 0 : index
    %c0_12 = arith.constant 0 : index
    %12 = vector.load %arg5[%c0_10, %c0_11, %c0_12] : memref<2x1x96xf32, #tpu.memory_space<vmem>>, vector<1x1x96xf32>
    %13 = vector.shape_cast %12 : vector<1x1x96xf32> to vector<1x96xf32>
    %14 = vector.broadcast %13 : vector<1x96xf32> to vector<16x96xf32>
    %15 = arith.addf %11, %14 : vector<16x96xf32>
    %16 = vector.extract_strided_slice %15 {offsets = [0, 0], sizes = [16, 8], strides = [1, 1]} : vector<16x96xf32> to vector<16x8xf32>
    %17 = vector.extract_strided_slice %15 {offsets = [0, 8], sizes = [16, 8], strides = [1, 1]} : vector<16x96xf32> to vector<16x8xf32>
    %18 = vector.extract_strided_slice %15 {offsets = [0, 16], sizes = [16, 8], strides = [1, 1]} : vector<16x96xf32> to vector<16x8xf32>
    %19 = vector.extract_strided_slice %15 {offsets = [0, 24], sizes = [16, 8], strides = [1, 1]} : vector<16x96xf32> to vector<16x8xf32>
    %20 = vector.shape_cast %16 : vector<16x8xf32> to vector<1x16x8xf32>
    %21 = vector.shape_cast %17 : vector<16x8xf32> to vector<1x16x8xf32>
    %22 = vector.shape_cast %18 : vector<16x8xf32> to vector<1x16x8xf32>
    %23 = vector.shape_cast %19 : vector<16x8xf32> to vector<1x16x8xf32>
    %24 = tpu.concatenate %20, %21, %22, %23 in 0 : vector<1x16x8xf32>, vector<1x16x8xf32>, vector<1x16x8xf32>, vector<1x16x8xf32> -> vector<4x16x8xf32>
    %25 = vector.extract_strided_slice %15 {offsets = [0, 32], sizes = [16, 8], strides = [1, 1]} : vector<16x96xf32> to vector<16x8xf32>
    %26 = vector.extract_strided_slice %15 {offsets = [0, 40], sizes = [16, 8], strides = [1, 1]} : vector<16x96xf32> to vector<16x8xf32>
    %27 = vector.extract_strided_slice %15 {offsets = [0, 48], sizes = [16, 8], strides = [1, 1]} : vector<16x96xf32> to vector<16x8xf32>
    %28 = vector.extract_strided_slice %15 {offsets = [0, 56], sizes = [16, 8], strides = [1, 1]} : vector<16x96xf32> to vector<16x8xf32>
    %29 = vector.shape_cast %25 : vector<16x8xf32> to vector<1x16x8xf32>
    %30 = vector.shape_cast %26 : vector<16x8xf32> to vector<1x16x8xf32>
    %31 = vector.shape_cast %27 : vector<16x8xf32> to vector<1x16x8xf32>
    %32 = vector.shape_cast %28 : vector<16x8xf32> to vector<1x16x8xf32>
    %33 = tpu.concatenate %29, %30, %31, %32 in 0 : vector<1x16x8xf32>, vector<1x16x8xf32>, vector<1x16x8xf32>, vector<1x16x8xf32> -> vector<4x16x8xf32>
    %34 = vector.extract_strided_slice %15 {offsets = [0, 64], sizes = [16, 8], strides = [1, 1]} : vector<16x96xf32> to vector<16x8xf32>
    %35 = vector.extract_strided_slice %15 {offsets = [0, 72], sizes = [16, 8], strides = [1, 1]} : vector<16x96xf32> to vector<16x8xf32>
    %36 = vector.extract_strided_slice %15 {offsets = [0, 80], sizes = [16, 8], strides = [1, 1]} : vector<16x96xf32> to vector<16x8xf32>
    %37 = vector.extract_strided_slice %15 {offsets = [0, 88], sizes = [16, 8], strides = [1, 1]} : vector<16x96xf32> to vector<16x8xf32>
    %38 = vector.shape_cast %34 : vector<16x8xf32> to vector<1x16x8xf32>
    %39 = vector.shape_cast %35 : vector<16x8xf32> to vector<1x16x8xf32>
    %40 = vector.shape_cast %36 : vector<16x8xf32> to vector<1x16x8xf32>
    %41 = vector.shape_cast %37 : vector<16x8xf32> to vector<1x16x8xf32>
    %42 = tpu.concatenate %38, %39, %40, %41 in 0 : vector<1x16x8xf32>, vector<1x16x8xf32>, vector<1x16x8xf32>, vector<1x16x8xf32> -> vector<4x16x8xf32>
    "tpu.trace_start"() <{level = 10 : i32, message = "hqd,hkd->hqk"}> : () -> ()
    %cst_13 = arith.constant dense<0.000000e+00> : vector<4x16x16xf32>
    %43 = tpu.matmul %24, %33, %cst_13 {dimension_numbers = #tpu.dot_dimension_numbers<[2], [2], [1], [1], [0, 0, 0, 1, 1, 1], [0], [0]>} : vector<4x16x8xf32>, vector<4x16x8xf32>, vector<4x16x16xf32> -> vector<4x16x16xf32>
    "tpu.trace_stop"() : () -> ()
    %cst_14 = arith.constant 0.353553385 : f32
    %44 = vector.broadcast %cst_14 : f32 to vector<4x16x16xf32>
    %45 = arith.mulf %43, %44 : vector<4x16x16xf32>
    %cst_15 = arith.constant -1.000000e+30 : f32
    %46 = vector.shape_cast %8 : vector<1x1x16xi1> to vector<1x1x16xi1>
    %47 = vector.broadcast %46 : vector<1x1x16xi1> to vector<4x16x16xi1>
    %48 = vector.broadcast %cst_15 : f32 to vector<4x16x16xf32>
    %49 = arith.select %47, %45, %48 : vector<4x16x16xi1>, vector<4x16x16xf32>
    %cst_16 = arith.constant dense<0xFF800000> : vector<4x16xf32>
    %50 = vector.multi_reduction <maximumf>, %49, %cst_16 [2] : vector<4x16x16xf32> to vector<4x16xf32>
    %51 = vector.shape_cast %50 : vector<4x16xf32> to vector<4x16x1xf32>
    %52 = vector.broadcast %51 : vector<4x16x1xf32> to vector<4x16x16xf32>
    %53 = arith.subf %49, %52 : vector<4x16x16xf32>
    %54 = math.exp %53 : vector<4x16x16xf32>
    %cst_17 = arith.constant dense<0.000000e+00> : vector<4x16xf32>
    %55 = vector.multi_reduction <add>, %54, %cst_17 [2] : vector<4x16x16xf32> to vector<4x16xf32>
    %56 = vector.shape_cast %55 : vector<4x16xf32> to vector<4x16x1xf32>
    %57 = tpu.reciprocal %56 {approx = true} : vector<4x16x1xf32> -> vector<4x16x1xf32>
    %58 = vector.broadcast %57 : vector<4x16x1xf32> to vector<4x16x16xf32>
    %59 = arith.mulf %54, %58 : vector<4x16x16xf32>
    "tpu.trace_start"() <{level = 10 : i32, message = "hqk,hkd->hqd"}> : () -> ()
    %cst_18 = arith.constant dense<0.000000e+00> : vector<4x16x8xf32>
    %60 = tpu.matmul %59, %42, %cst_18 {dimension_numbers = #tpu.dot_dimension_numbers<[2], [1], [1], [2], [0, 0, 0, 1, 1, 2], [0], [0]>} : vector<4x16x16xf32>, vector<4x16x8xf32>, vector<4x16x8xf32> -> vector<4x16x8xf32>
    "tpu.trace_stop"() : () -> ()
    %61 = vector.extract_strided_slice %60 {offsets = [0, 0, 0], sizes = [1, 16, 8], strides = [1, 1, 1]} : vector<4x16x8xf32> to vector<1x16x8xf32>
    %62 = vector.shape_cast %61 : vector<1x16x8xf32> to vector<16x8xf32>
    %63 = vector.extract_strided_slice %60 {offsets = [1, 0, 0], sizes = [1, 16, 8], strides = [1, 1, 1]} : vector<4x16x8xf32> to vector<1x16x8xf32>
    %64 = vector.shape_cast %63 : vector<1x16x8xf32> to vector<16x8xf32>
    %65 = vector.extract_strided_slice %60 {offsets = [2, 0, 0], sizes = [1, 16, 8], strides = [1, 1, 1]} : vector<4x16x8xf32> to vector<1x16x8xf32>
    %66 = vector.shape_cast %65 : vector<1x16x8xf32> to vector<16x8xf32>
    %67 = vector.extract_strided_slice %60 {offsets = [3, 0, 0], sizes = [1, 16, 8], strides = [1, 1, 1]} : vector<4x16x8xf32> to vector<1x16x8xf32>
    %68 = vector.shape_cast %67 : vector<1x16x8xf32> to vector<16x8xf32>
    %69 = tpu.concatenate %62, %64, %66, %68 in 1 : vector<16x8xf32>, vector<16x8xf32>, vector<16x8xf32>, vector<16x8xf32> -> vector<16x32xf32>
    %c0_19 = arith.constant 0 : index
    %c0_20 = arith.constant 0 : index
    %c0_21 = arith.constant 0 : index
    %70 = vector.load %arg6[%c0_19, %c0_20, %c0_21] : memref<2x32x32xf32, #tpu.memory_space<vmem>>, vector<1x32x32xf32>
    %71 = vector.shape_cast %70 : vector<1x32x32xf32> to vector<32x32xf32>
    %cst_22 = arith.constant dense<0.000000e+00> : vector<16x32xf32>
    %72 = tpu.matmul %69, %71, %cst_22 {dimension_numbers = #tpu.dot_dimension_numbers<[1], [0], [0], [1], [0, 0, 1, 1], [], []>} : vector<16x32xf32>, vector<32x32xf32>, vector<16x32xf32> -> vector<16x32xf32>
    %c0_23 = arith.constant 0 : index
    %c0_24 = arith.constant 0 : index
    %c0_25 = arith.constant 0 : index
    %73 = vector.load %arg7[%c0_23, %c0_24, %c0_25] : memref<2x1x32xf32, #tpu.memory_space<vmem>>, vector<1x1x32xf32>
    %74 = vector.shape_cast %73 : vector<1x1x32xf32> to vector<1x32xf32>
    %75 = vector.broadcast %74 : vector<1x32xf32> to vector<16x32xf32>
    %76 = arith.addf %72, %75 : vector<16x32xf32>
    %77 = arith.addf %5, %76 : vector<16x32xf32>
    %c0_26 = arith.constant 0 : index
    %c0_27 = arith.constant 0 : index
    %c0_28 = arith.constant 0 : index
    %78 = vector.load %arg12[%c0_26, %c0_27, %c0_28] : memref<2x1x32xf32, #tpu.memory_space<vmem>>, vector<1x1x32xf32>
    %79 = vector.shape_cast %78 : vector<1x1x32xf32> to vector<1x32xf32>
    %c0_29 = arith.constant 0 : index
    %c0_30 = arith.constant 0 : index
    %c0_31 = arith.constant 0 : index
    %80 = vector.load %arg13[%c0_29, %c0_30, %c0_31] : memref<2x1x32xf32, #tpu.memory_space<vmem>>, vector<1x1x32xf32>
    %81 = vector.shape_cast %80 : vector<1x1x32xf32> to vector<1x32xf32>
    %cst_32 = arith.constant dense<0.000000e+00> : vector<16xf32>
    %82 = vector.multi_reduction <add>, %77, %cst_32 [1] : vector<16x32xf32> to vector<16xf32>
    %83 = vector.shape_cast %82 : vector<16xf32> to vector<16x1xf32>
    %cst_33 = arith.constant 3.200000e+01 : f32
    %84 = vector.broadcast %cst_33 : f32 to vector<16x1xf32>
    %85 = arith.divf %83, %84 : vector<16x1xf32>
    %86 = vector.broadcast %85 : vector<16x1xf32> to vector<16x32xf32>
    %87 = arith.subf %77, %86 : vector<16x32xf32>
    %88 = arith.mulf %87, %87 : vector<16x32xf32>
    %cst_34 = arith.constant dense<0.000000e+00> : vector<16xf32>
    %89 = vector.multi_reduction <add>, %88, %cst_34 [1] : vector<16x32xf32> to vector<16xf32>
    %90 = vector.shape_cast %89 : vector<16xf32> to vector<16x1xf32>
    %cst_35 = arith.constant 3.200000e+01 : f32
    %91 = vector.broadcast %cst_35 : f32 to vector<16x1xf32>
    %92 = arith.divf %90, %91 : vector<16x1xf32>
    %93 = vector.broadcast %85 : vector<16x1xf32> to vector<16x32xf32>
    %94 = arith.subf %77, %93 : vector<16x32xf32>
    %cst_36 = arith.constant 9.99999974E-6 : f32
    %95 = vector.broadcast %cst_36 : f32 to vector<16x1xf32>
    %96 = arith.addf %92, %95 : vector<16x1xf32>
    %97 = math.rsqrt %96 : vector<16x1xf32>
    %98 = vector.broadcast %97 : vector<16x1xf32> to vector<16x32xf32>
    %99 = arith.mulf %94, %98 : vector<16x32xf32>
    %100 = vector.broadcast %79 : vector<1x32xf32> to vector<16x32xf32>
    %101 = arith.mulf %99, %100 : vector<16x32xf32>
    %102 = vector.broadcast %81 : vector<1x32xf32> to vector<16x32xf32>
    %103 = arith.addf %101, %102 : vector<16x32xf32>
    %c0_37 = arith.constant 0 : index
    %c0_38 = arith.constant 0 : index
    %c0_39 = arith.constant 0 : index
    %104 = vector.load %arg8[%c0_37, %c0_38, %c0_39] : memref<2x32x64xf32, #tpu.memory_space<vmem>>, vector<1x32x64xf32>
    %105 = vector.shape_cast %104 : vector<1x32x64xf32> to vector<32x64xf32>
    %cst_40 = arith.constant dense<0.000000e+00> : vector<16x64xf32>
    %106 = tpu.matmul %103, %105, %cst_40 {dimension_numbers = #tpu.dot_dimension_numbers<[1], [0], [0], [1], [0, 0, 1, 1], [], []>} : vector<16x32xf32>, vector<32x64xf32>, vector<16x64xf32> -> vector<16x64xf32>
    %c0_41 = arith.constant 0 : index
    %c0_42 = arith.constant 0 : index
    %c0_43 = arith.constant 0 : index
    %107 = vector.load %arg9[%c0_41, %c0_42, %c0_43] : memref<2x1x64xf32, #tpu.memory_space<vmem>>, vector<1x1x64xf32>
    %108 = vector.shape_cast %107 : vector<1x1x64xf32> to vector<1x64xf32>
    %109 = vector.broadcast %108 : vector<1x64xf32> to vector<16x64xf32>
    %110 = arith.addf %106, %109 : vector<16x64xf32>
    %cst_44 = arith.constant 0.000000e+00 : f32
    %111 = vector.broadcast %cst_44 : f32 to vector<16x64xf32>
    %112 = arith.maximumf %110, %111 : vector<16x64xf32>
    %c0_45 = arith.constant 0 : index
    %c0_46 = arith.constant 0 : index
    %c0_47 = arith.constant 0 : index
    %113 = vector.load %arg10[%c0_45, %c0_46, %c0_47] : memref<2x64x32xf32, #tpu.memory_space<vmem>>, vector<1x64x32xf32>
    %114 = vector.shape_cast %113 : vector<1x64x32xf32> to vector<64x32xf32>
    %cst_48 = arith.constant dense<0.000000e+00> : vector<16x32xf32>
    %115 = tpu.matmul %112, %114, %cst_48 {dimension_numbers = #tpu.dot_dimension_numbers<[1], [0], [0], [1], [0, 0, 1, 1], [], []>} : vector<16x64xf32>, vector<64x32xf32>, vector<16x32xf32> -> vector<16x32xf32>
    %c0_49 = arith.constant 0 : index
    %c0_50 = arith.constant 0 : index
    %c0_51 = arith.constant 0 : index
    %116 = vector.load %arg11[%c0_49, %c0_50, %c0_51] : memref<2x1x32xf32, #tpu.memory_space<vmem>>, vector<1x1x32xf32>
    %117 = vector.shape_cast %116 : vector<1x1x32xf32> to vector<1x32xf32>
    %118 = vector.broadcast %117 : vector<1x32xf32> to vector<16x32xf32>
    %119 = arith.addf %115, %118 : vector<16x32xf32>
    %120 = arith.addf %103, %119 : vector<16x32xf32>
    %c0_52 = arith.constant 0 : index
    %c0_53 = arith.constant 0 : index
    %c0_54 = arith.constant 0 : index
    %121 = vector.load %arg14[%c0_52, %c0_53, %c0_54] : memref<2x1x32xf32, #tpu.memory_space<vmem>>, vector<1x1x32xf32>
    %122 = vector.shape_cast %121 : vector<1x1x32xf32> to vector<1x32xf32>
    %c0_55 = arith.constant 0 : index
    %c0_56 = arith.constant 0 : index
    %c0_57 = arith.constant 0 : index
    %123 = vector.load %arg15[%c0_55, %c0_56, %c0_57] : memref<2x1x32xf32, #tpu.memory_space<vmem>>, vector<1x1x32xf32>
    %124 = vector.shape_cast %123 : vector<1x1x32xf32> to vector<1x32xf32>
    %cst_58 = arith.constant dense<0.000000e+00> : vector<16xf32>
    %125 = vector.multi_reduction <add>, %120, %cst_58 [1] : vector<16x32xf32> to vector<16xf32>
    %126 = vector.shape_cast %125 : vector<16xf32> to vector<16x1xf32>
    %cst_59 = arith.constant 3.200000e+01 : f32
    %127 = vector.broadcast %cst_59 : f32 to vector<16x1xf32>
    %128 = arith.divf %126, %127 : vector<16x1xf32>
    %129 = vector.broadcast %128 : vector<16x1xf32> to vector<16x32xf32>
    %130 = arith.subf %120, %129 : vector<16x32xf32>
    %131 = arith.mulf %130, %130 : vector<16x32xf32>
    %cst_60 = arith.constant dense<0.000000e+00> : vector<16xf32>
    %132 = vector.multi_reduction <add>, %131, %cst_60 [1] : vector<16x32xf32> to vector<16xf32>
    %133 = vector.shape_cast %132 : vector<16xf32> to vector<16x1xf32>
    %cst_61 = arith.constant 3.200000e+01 : f32
    %134 = vector.broadcast %cst_61 : f32 to vector<16x1xf32>
    %135 = arith.divf %133, %134 : vector<16x1xf32>
    %136 = vector.broadcast %128 : vector<16x1xf32> to vector<16x32xf32>
    %137 = arith.subf %120, %136 : vector<16x32xf32>
    %cst_62 = arith.constant 9.99999974E-6 : f32
    %138 = vector.broadcast %cst_62 : f32 to vector<16x1xf32>
    %139 = arith.addf %135, %138 : vector<16x1xf32>
    %140 = math.rsqrt %139 : vector<16x1xf32>
    %141 = vector.broadcast %140 : vector<16x1xf32> to vector<16x32xf32>
    %142 = arith.mulf %137, %141 : vector<16x32xf32>
    %143 = vector.broadcast %122 : vector<1x32xf32> to vector<16x32xf32>
    %144 = arith.mulf %142, %143 : vector<16x32xf32>
    %145 = vector.broadcast %124 : vector<1x32xf32> to vector<16x32xf32>
    %146 = arith.addf %144, %145 : vector<16x32xf32>
    %c1 = arith.constant 1 : index
    %c0_63 = arith.constant 0 : index
    %c0_64 = arith.constant 0 : index
    %147 = vector.load %arg4[%c1, %c0_63, %c0_64] : memref<2x32x96xf32, #tpu.memory_space<vmem>>, vector<1x32x96xf32>
    %148 = vector.shape_cast %147 : vector<1x32x96xf32> to vector<32x96xf32>
    %cst_65 = arith.constant dense<0.000000e+00> : vector<16x96xf32>
    %149 = tpu.matmul %146, %148, %cst_65 {dimension_numbers = #tpu.dot_dimension_numbers<[1], [0], [0], [1], [0, 0, 1, 1], [], []>} : vector<16x32xf32>, vector<32x96xf32>, vector<16x96xf32> -> vector<16x96xf32>
    %c1_66 = arith.constant 1 : index
    %c0_67 = arith.constant 0 : index
    %c0_68 = arith.constant 0 : index
    %150 = vector.load %arg5[%c1_66, %c0_67, %c0_68] : memref<2x1x96xf32, #tpu.memory_space<vmem>>, vector<1x1x96xf32>
    %151 = vector.shape_cast %150 : vector<1x1x96xf32> to vector<1x96xf32>
    %152 = vector.broadcast %151 : vector<1x96xf32> to vector<16x96xf32>
    %153 = arith.addf %149, %152 : vector<16x96xf32>
    %154 = vector.extract_strided_slice %153 {offsets = [0, 0], sizes = [16, 8], strides = [1, 1]} : vector<16x96xf32> to vector<16x8xf32>
    %155 = vector.extract_strided_slice %153 {offsets = [0, 8], sizes = [16, 8], strides = [1, 1]} : vector<16x96xf32> to vector<16x8xf32>
    %156 = vector.extract_strided_slice %153 {offsets = [0, 16], sizes = [16, 8], strides = [1, 1]} : vector<16x96xf32> to vector<16x8xf32>
    %157 = vector.extract_strided_slice %153 {offsets = [0, 24], sizes = [16, 8], strides = [1, 1]} : vector<16x96xf32> to vector<16x8xf32>
    %158 = vector.shape_cast %154 : vector<16x8xf32> to vector<1x16x8xf32>
    %159 = vector.shape_cast %155 : vector<16x8xf32> to vector<1x16x8xf32>
    %160 = vector.shape_cast %156 : vector<16x8xf32> to vector<1x16x8xf32>
    %161 = vector.shape_cast %157 : vector<16x8xf32> to vector<1x16x8xf32>
    %162 = tpu.concatenate %158, %159, %160, %161 in 0 : vector<1x16x8xf32>, vector<1x16x8xf32>, vector<1x16x8xf32>, vector<1x16x8xf32> -> vector<4x16x8xf32>
    %163 = vector.extract_strided_slice %153 {offsets = [0, 32], sizes = [16, 8], strides = [1, 1]} : vector<16x96xf32> to vector<16x8xf32>
    %164 = vector.extract_strided_slice %153 {offsets = [0, 40], sizes = [16, 8], strides = [1, 1]} : vector<16x96xf32> to vector<16x8xf32>
    %165 = vector.extract_strided_slice %153 {offsets = [0, 48], sizes = [16, 8], strides = [1, 1]} : vector<16x96xf32> to vector<16x8xf32>
    %166 = vector.extract_strided_slice %153 {offsets = [0, 56], sizes = [16, 8], strides = [1, 1]} : vector<16x96xf32> to vector<16x8xf32>
    %167 = vector.shape_cast %163 : vector<16x8xf32> to vector<1x16x8xf32>
    %168 = vector.shape_cast %164 : vector<16x8xf32> to vector<1x16x8xf32>
    %169 = vector.shape_cast %165 : vector<16x8xf32> to vector<1x16x8xf32>
    %170 = vector.shape_cast %166 : vector<16x8xf32> to vector<1x16x8xf32>
    %171 = tpu.concatenate %167, %168, %169, %170 in 0 : vector<1x16x8xf32>, vector<1x16x8xf32>, vector<1x16x8xf32>, vector<1x16x8xf32> -> vector<4x16x8xf32>
    %172 = vector.extract_strided_slice %153 {offsets = [0, 64], sizes = [16, 8], strides = [1, 1]} : vector<16x96xf32> to vector<16x8xf32>
    %173 = vector.extract_strided_slice %153 {offsets = [0, 72], sizes = [16, 8], strides = [1, 1]} : vector<16x96xf32> to vector<16x8xf32>
    %174 = vector.extract_strided_slice %153 {offsets = [0, 80], sizes = [16, 8], strides = [1, 1]} : vector<16x96xf32> to vector<16x8xf32>
    %175 = vector.extract_strided_slice %153 {offsets = [0, 88], sizes = [16, 8], strides = [1, 1]} : vector<16x96xf32> to vector<16x8xf32>
    %176 = vector.shape_cast %172 : vector<16x8xf32> to vector<1x16x8xf32>
    %177 = vector.shape_cast %173 : vector<16x8xf32> to vector<1x16x8xf32>
    %178 = vector.shape_cast %174 : vector<16x8xf32> to vector<1x16x8xf32>
    %179 = vector.shape_cast %175 : vector<16x8xf32> to vector<1x16x8xf32>
    %180 = tpu.concatenate %176, %177, %178, %179 in 0 : vector<1x16x8xf32>, vector<1x16x8xf32>, vector<1x16x8xf32>, vector<1x16x8xf32> -> vector<4x16x8xf32>
    "tpu.trace_start"() <{level = 10 : i32, message = "hqd,hkd->hqk"}> : () -> ()
    %cst_69 = arith.constant dense<0.000000e+00> : vector<4x16x16xf32>
    %181 = tpu.matmul %162, %171, %cst_69 {dimension_numbers = #tpu.dot_dimension_numbers<[2], [2], [1], [1], [0, 0, 0, 1, 1, 1], [0], [0]>} : vector<4x16x8xf32>, vector<4x16x8xf32>, vector<4x16x16xf32> -> vector<4x16x16xf32>
    "tpu.trace_stop"() : () -> ()
    %cst_70 = arith.constant 0.353553385 : f32
    %182 = vector.broadcast %cst_70 : f32 to vector<4x16x16xf32>
    %183 = arith.mulf %181, %182 : vector<4x16x16xf32>
    %cst_71 = arith.constant -1.000000e+30 : f32
    %184 = vector.shape_cast %8 : vector<1x1x16xi1> to vector<1x1x16xi1>
    %185 = vector.broadcast %184 : vector<1x1x16xi1> to vector<4x16x16xi1>
    %186 = vector.broadcast %cst_71 : f32 to vector<4x16x16xf32>
    %187 = arith.select %185, %183, %186 : vector<4x16x16xi1>, vector<4x16x16xf32>
    %cst_72 = arith.constant dense<0xFF800000> : vector<4x16xf32>
    %188 = vector.multi_reduction <maximumf>, %187, %cst_72 [2] : vector<4x16x16xf32> to vector<4x16xf32>
    %189 = vector.shape_cast %188 : vector<4x16xf32> to vector<4x16x1xf32>
    %190 = vector.broadcast %189 : vector<4x16x1xf32> to vector<4x16x16xf32>
    %191 = arith.subf %187, %190 : vector<4x16x16xf32>
    %192 = math.exp %191 : vector<4x16x16xf32>
    %cst_73 = arith.constant dense<0.000000e+00> : vector<4x16xf32>
    %193 = vector.multi_reduction <add>, %192, %cst_73 [2] : vector<4x16x16xf32> to vector<4x16xf32>
    %194 = vector.shape_cast %193 : vector<4x16xf32> to vector<4x16x1xf32>
    %195 = tpu.reciprocal %194 {approx = true} : vector<4x16x1xf32> -> vector<4x16x1xf32>
    %196 = vector.broadcast %195 : vector<4x16x1xf32> to vector<4x16x16xf32>
    %197 = arith.mulf %192, %196 : vector<4x16x16xf32>
    "tpu.trace_start"() <{level = 10 : i32, message = "hqk,hkd->hqd"}> : () -> ()
    %cst_74 = arith.constant dense<0.000000e+00> : vector<4x16x8xf32>
    %198 = tpu.matmul %197, %180, %cst_74 {dimension_numbers = #tpu.dot_dimension_numbers<[2], [1], [1], [2], [0, 0, 0, 1, 1, 2], [0], [0]>} : vector<4x16x16xf32>, vector<4x16x8xf32>, vector<4x16x8xf32> -> vector<4x16x8xf32>
    "tpu.trace_stop"() : () -> ()
    %199 = vector.extract_strided_slice %198 {offsets = [0, 0, 0], sizes = [1, 16, 8], strides = [1, 1, 1]} : vector<4x16x8xf32> to vector<1x16x8xf32>
    %200 = vector.shape_cast %199 : vector<1x16x8xf32> to vector<16x8xf32>
    %201 = vector.extract_strided_slice %198 {offsets = [1, 0, 0], sizes = [1, 16, 8], strides = [1, 1, 1]} : vector<4x16x8xf32> to vector<1x16x8xf32>
    %202 = vector.shape_cast %201 : vector<1x16x8xf32> to vector<16x8xf32>
    %203 = vector.extract_strided_slice %198 {offsets = [2, 0, 0], sizes = [1, 16, 8], strides = [1, 1, 1]} : vector<4x16x8xf32> to vector<1x16x8xf32>
    %204 = vector.shape_cast %203 : vector<1x16x8xf32> to vector<16x8xf32>
    %205 = vector.extract_strided_slice %198 {offsets = [3, 0, 0], sizes = [1, 16, 8], strides = [1, 1, 1]} : vector<4x16x8xf32> to vector<1x16x8xf32>
    %206 = vector.shape_cast %205 : vector<1x16x8xf32> to vector<16x8xf32>
    %207 = tpu.concatenate %200, %202, %204, %206 in 1 : vector<16x8xf32>, vector<16x8xf32>, vector<16x8xf32>, vector<16x8xf32> -> vector<16x32xf32>
    %c1_75 = arith.constant 1 : index
    %c0_76 = arith.constant 0 : index
    %c0_77 = arith.constant 0 : index
    %208 = vector.load %arg6[%c1_75, %c0_76, %c0_77] : memref<2x32x32xf32, #tpu.memory_space<vmem>>, vector<1x32x32xf32>
    %209 = vector.shape_cast %208 : vector<1x32x32xf32> to vector<32x32xf32>
    %cst_78 = arith.constant dense<0.000000e+00> : vector<16x32xf32>
    %210 = tpu.matmul %207, %209, %cst_78 {dimension_numbers = #tpu.dot_dimension_numbers<[1], [0], [0], [1], [0, 0, 1, 1], [], []>} : vector<16x32xf32>, vector<32x32xf32>, vector<16x32xf32> -> vector<16x32xf32>
    %c1_79 = arith.constant 1 : index
    %c0_80 = arith.constant 0 : index
    %c0_81 = arith.constant 0 : index
    %211 = vector.load %arg7[%c1_79, %c0_80, %c0_81] : memref<2x1x32xf32, #tpu.memory_space<vmem>>, vector<1x1x32xf32>
    %212 = vector.shape_cast %211 : vector<1x1x32xf32> to vector<1x32xf32>
    %213 = vector.broadcast %212 : vector<1x32xf32> to vector<16x32xf32>
    %214 = arith.addf %210, %213 : vector<16x32xf32>
    %215 = arith.addf %146, %214 : vector<16x32xf32>
    %c1_82 = arith.constant 1 : index
    %c0_83 = arith.constant 0 : index
    %c0_84 = arith.constant 0 : index
    %216 = vector.load %arg12[%c1_82, %c0_83, %c0_84] : memref<2x1x32xf32, #tpu.memory_space<vmem>>, vector<1x1x32xf32>
    %217 = vector.shape_cast %216 : vector<1x1x32xf32> to vector<1x32xf32>
    %c1_85 = arith.constant 1 : index
    %c0_86 = arith.constant 0 : index
    %c0_87 = arith.constant 0 : index
    %218 = vector.load %arg13[%c1_85, %c0_86, %c0_87] : memref<2x1x32xf32, #tpu.memory_space<vmem>>, vector<1x1x32xf32>
    %219 = vector.shape_cast %218 : vector<1x1x32xf32> to vector<1x32xf32>
    %cst_88 = arith.constant dense<0.000000e+00> : vector<16xf32>
    %220 = vector.multi_reduction <add>, %215, %cst_88 [1] : vector<16x32xf32> to vector<16xf32>
    %221 = vector.shape_cast %220 : vector<16xf32> to vector<16x1xf32>
    %cst_89 = arith.constant 3.200000e+01 : f32
    %222 = vector.broadcast %cst_89 : f32 to vector<16x1xf32>
    %223 = arith.divf %221, %222 : vector<16x1xf32>
    %224 = vector.broadcast %223 : vector<16x1xf32> to vector<16x32xf32>
    %225 = arith.subf %215, %224 : vector<16x32xf32>
    %226 = arith.mulf %225, %225 : vector<16x32xf32>
    %cst_90 = arith.constant dense<0.000000e+00> : vector<16xf32>
    %227 = vector.multi_reduction <add>, %226, %cst_90 [1] : vector<16x32xf32> to vector<16xf32>
    %228 = vector.shape_cast %227 : vector<16xf32> to vector<16x1xf32>
    %cst_91 = arith.constant 3.200000e+01 : f32
    %229 = vector.broadcast %cst_91 : f32 to vector<16x1xf32>
    %230 = arith.divf %228, %229 : vector<16x1xf32>
    %231 = vector.broadcast %223 : vector<16x1xf32> to vector<16x32xf32>
    %232 = arith.subf %215, %231 : vector<16x32xf32>
    %cst_92 = arith.constant 9.99999974E-6 : f32
    %233 = vector.broadcast %cst_92 : f32 to vector<16x1xf32>
    %234 = arith.addf %230, %233 : vector<16x1xf32>
    %235 = math.rsqrt %234 : vector<16x1xf32>
    %236 = vector.broadcast %235 : vector<16x1xf32> to vector<16x32xf32>
    %237 = arith.mulf %232, %236 : vector<16x32xf32>
    %238 = vector.broadcast %217 : vector<1x32xf32> to vector<16x32xf32>
    %239 = arith.mulf %237, %238 : vector<16x32xf32>
    %240 = vector.broadcast %219 : vector<1x32xf32> to vector<16x32xf32>
    %241 = arith.addf %239, %240 : vector<16x32xf32>
    %c1_93 = arith.constant 1 : index
    %c0_94 = arith.constant 0 : index
    %c0_95 = arith.constant 0 : index
    %242 = vector.load %arg8[%c1_93, %c0_94, %c0_95] : memref<2x32x64xf32, #tpu.memory_space<vmem>>, vector<1x32x64xf32>
    %243 = vector.shape_cast %242 : vector<1x32x64xf32> to vector<32x64xf32>
    %cst_96 = arith.constant dense<0.000000e+00> : vector<16x64xf32>
    %244 = tpu.matmul %241, %243, %cst_96 {dimension_numbers = #tpu.dot_dimension_numbers<[1], [0], [0], [1], [0, 0, 1, 1], [], []>} : vector<16x32xf32>, vector<32x64xf32>, vector<16x64xf32> -> vector<16x64xf32>
    %c1_97 = arith.constant 1 : index
    %c0_98 = arith.constant 0 : index
    %c0_99 = arith.constant 0 : index
    %245 = vector.load %arg9[%c1_97, %c0_98, %c0_99] : memref<2x1x64xf32, #tpu.memory_space<vmem>>, vector<1x1x64xf32>
    %246 = vector.shape_cast %245 : vector<1x1x64xf32> to vector<1x64xf32>
    %247 = vector.broadcast %246 : vector<1x64xf32> to vector<16x64xf32>
    %248 = arith.addf %244, %247 : vector<16x64xf32>
    %cst_100 = arith.constant 0.000000e+00 : f32
    %249 = vector.broadcast %cst_100 : f32 to vector<16x64xf32>
    %250 = arith.maximumf %248, %249 : vector<16x64xf32>
    %c1_101 = arith.constant 1 : index
    %c0_102 = arith.constant 0 : index
    %c0_103 = arith.constant 0 : index
    %251 = vector.load %arg10[%c1_101, %c0_102, %c0_103] : memref<2x64x32xf32, #tpu.memory_space<vmem>>, vector<1x64x32xf32>
    %252 = vector.shape_cast %251 : vector<1x64x32xf32> to vector<64x32xf32>
    %cst_104 = arith.constant dense<0.000000e+00> : vector<16x32xf32>
    %253 = tpu.matmul %250, %252, %cst_104 {dimension_numbers = #tpu.dot_dimension_numbers<[1], [0], [0], [1], [0, 0, 1, 1], [], []>} : vector<16x64xf32>, vector<64x32xf32>, vector<16x32xf32> -> vector<16x32xf32>
    %c1_105 = arith.constant 1 : index
    %c0_106 = arith.constant 0 : index
    %c0_107 = arith.constant 0 : index
    %254 = vector.load %arg11[%c1_105, %c0_106, %c0_107] : memref<2x1x32xf32, #tpu.memory_space<vmem>>, vector<1x1x32xf32>
    %255 = vector.shape_cast %254 : vector<1x1x32xf32> to vector<1x32xf32>
    %256 = vector.broadcast %255 : vector<1x32xf32> to vector<16x32xf32>
    %257 = arith.addf %253, %256 : vector<16x32xf32>
    %258 = arith.addf %241, %257 : vector<16x32xf32>
    %c1_108 = arith.constant 1 : index
    %c0_109 = arith.constant 0 : index
    %c0_110 = arith.constant 0 : index
    %259 = vector.load %arg14[%c1_108, %c0_109, %c0_110] : memref<2x1x32xf32, #tpu.memory_space<vmem>>, vector<1x1x32xf32>
    %260 = vector.shape_cast %259 : vector<1x1x32xf32> to vector<1x32xf32>
    %c1_111 = arith.constant 1 : index
    %c0_112 = arith.constant 0 : index
    %c0_113 = arith.constant 0 : index
    %261 = vector.load %arg15[%c1_111, %c0_112, %c0_113] : memref<2x1x32xf32, #tpu.memory_space<vmem>>, vector<1x1x32xf32>
    %262 = vector.shape_cast %261 : vector<1x1x32xf32> to vector<1x32xf32>
    %cst_114 = arith.constant dense<0.000000e+00> : vector<16xf32>
    %263 = vector.multi_reduction <add>, %258, %cst_114 [1] : vector<16x32xf32> to vector<16xf32>
    %264 = vector.shape_cast %263 : vector<16xf32> to vector<16x1xf32>
    %cst_115 = arith.constant 3.200000e+01 : f32
    %265 = vector.broadcast %cst_115 : f32 to vector<16x1xf32>
    %266 = arith.divf %264, %265 : vector<16x1xf32>
    %267 = vector.broadcast %266 : vector<16x1xf32> to vector<16x32xf32>
    %268 = arith.subf %258, %267 : vector<16x32xf32>
    %269 = arith.mulf %268, %268 : vector<16x32xf32>
    %cst_116 = arith.constant dense<0.000000e+00> : vector<16xf32>
    %270 = vector.multi_reduction <add>, %269, %cst_116 [1] : vector<16x32xf32> to vector<16xf32>
    %271 = vector.shape_cast %270 : vector<16xf32> to vector<16x1xf32>
    %cst_117 = arith.constant 3.200000e+01 : f32
    %272 = vector.broadcast %cst_117 : f32 to vector<16x1xf32>
    %273 = arith.divf %271, %272 : vector<16x1xf32>
    %274 = vector.broadcast %266 : vector<16x1xf32> to vector<16x32xf32>
    %275 = arith.subf %258, %274 : vector<16x32xf32>
    %cst_118 = arith.constant 9.99999974E-6 : f32
    %276 = vector.broadcast %cst_118 : f32 to vector<16x1xf32>
    %277 = arith.addf %273, %276 : vector<16x1xf32>
    %278 = math.rsqrt %277 : vector<16x1xf32>
    %279 = vector.broadcast %278 : vector<16x1xf32> to vector<16x32xf32>
    %280 = arith.mulf %275, %279 : vector<16x32xf32>
    %281 = vector.broadcast %260 : vector<1x32xf32> to vector<16x32xf32>
    %282 = arith.mulf %280, %281 : vector<16x32xf32>
    %283 = vector.broadcast %262 : vector<1x32xf32> to vector<16x32xf32>
    %284 = arith.addf %282, %283 : vector<16x32xf32>
    %285 = vector.extract_strided_slice %284 {offsets = [0, 0], sizes = [1, 32], strides = [1, 1]} : vector<16x32xf32> to vector<1x32xf32>
    %c0_119 = arith.constant 0 : index
    %c0_120 = arith.constant 0 : index
    %286 = vector.load %arg16[%c0_119, %c0_120] : memref<1x32xf32, #tpu.memory_space<vmem>>, vector<1x32xf32>
    %c0_121 = arith.constant 0 : index
    %c0_122 = arith.constant 0 : index
    %287 = vector.load %arg17[%c0_121, %c0_122] : memref<1x32xf32, #tpu.memory_space<vmem>>, vector<1x32xf32>
    %cst_123 = arith.constant dense<0.000000e+00> : vector<1xf32>
    %288 = vector.multi_reduction <add>, %285, %cst_123 [1] : vector<1x32xf32> to vector<1xf32>
    %289 = vector.shape_cast %288 : vector<1xf32> to vector<1x1xf32>
    %cst_124 = arith.constant 3.200000e+01 : f32
    %290 = vector.broadcast %cst_124 : f32 to vector<1x1xf32>
    %291 = arith.divf %289, %290 : vector<1x1xf32>
    %292 = vector.broadcast %291 : vector<1x1xf32> to vector<1x32xf32>
    %293 = arith.subf %285, %292 : vector<1x32xf32>
    %294 = arith.mulf %293, %293 : vector<1x32xf32>
    %cst_125 = arith.constant dense<0.000000e+00> : vector<1xf32>
    %295 = vector.multi_reduction <add>, %294, %cst_125 [1] : vector<1x32xf32> to vector<1xf32>
    %296 = vector.shape_cast %295 : vector<1xf32> to vector<1x1xf32>
    %cst_126 = arith.constant 3.200000e+01 : f32
    %297 = vector.broadcast %cst_126 : f32 to vector<1x1xf32>
    %298 = arith.divf %296, %297 : vector<1x1xf32>
    %299 = vector.broadcast %291 : vector<1x1xf32> to vector<1x32xf32>
    %300 = arith.subf %285, %299 : vector<1x32xf32>
    %cst_127 = arith.constant 9.99999974E-6 : f32
    %301 = vector.broadcast %cst_127 : f32 to vector<1x1xf32>
    %302 = arith.addf %298, %301 : vector<1x1xf32>
    %303 = math.rsqrt %302 : vector<1x1xf32>
    %304 = vector.broadcast %303 : vector<1x1xf32> to vector<1x32xf32>
    %305 = arith.mulf %300, %304 : vector<1x32xf32>
    %306 = arith.mulf %305, %286 : vector<1x32xf32>
    %307 = arith.addf %306, %287 : vector<1x32xf32>
    %c0_128 = arith.constant 0 : index
    %c0_129 = arith.constant 0 : index
    %308 = vector.load %arg18[%c0_128, %c0_129] : memref<32x128xf32, #tpu.memory_space<vmem>>, vector<32x128xf32>
    %cst_130 = arith.constant dense<0.000000e+00> : vector<1x128xf32>
    %309 = tpu.matmul %307, %308, %cst_130 {dimension_numbers = #tpu.dot_dimension_numbers<[1], [0], [0], [1], [0, 0, 1, 1], [], []>} : vector<1x32xf32>, vector<32x128xf32>, vector<1x128xf32> -> vector<1x128xf32>
    %c0_131 = arith.constant 0 : index
    %c0_132 = arith.constant 0 : index
    %310 = vector.load %arg19[%c0_131, %c0_132] : memref<1x128xf32, #tpu.memory_space<vmem>>, vector<1x128xf32>
    %311 = arith.addf %309, %310 : vector<1x128xf32>
    %c0_133 = arith.constant 0 : index
    %c0_134 = arith.constant 0 : index
    %c0_135 = arith.constant 0 : index
    %312 = vector.load %arg20[%c0_133, %c0_134, %c0_135] : memref<1x1x128xf32, #tpu.memory_space<vmem>>, vector<1x1x128xf32>
    %313 = vector.shape_cast %312 : vector<1x1x128xf32> to vector<1x128xf32>
    %314 = vector.shape_cast %311 : vector<1x128xf32> to vector<1x1x128xf32>
    tpu.vector_store %arg20[%c0_133, %c0_134, %c0_135], %314 {strides = array<i32>} : memref<1x1x128xf32, #tpu.memory_space<vmem>>, vector<1x1x128xf32>,
    return
  }
  func.func @transform_0(%arg0: i32) -> (i32, i32, i32) {
    %c0_i32 = arith.constant 0 : i32
    %c0_i32_0 = arith.constant 0 : i32
    %c0_i32_1 = arith.constant 0 : i32
    return %arg0, %c0_i32, %c0_i32_0 : i32, i32, i32
  }
  func.func @transform_1(%arg0: i32) -> (i32, i32) {
    %c0_i32 = arith.constant 0 : i32
    %c0_i32_0 = arith.constant 0 : i32
    %c0_i32_1 = arith.constant 0 : i32
    return %c0_i32, %c0_i32_0 : i32, i32
  }
  func.func @transform_2(%arg0: i32) -> (i32, i32) {
    %c0_i32 = arith.constant 0 : i32
    %c0_i32_0 = arith.constant 0 : i32
    %c0_i32_1 = arith.constant 0 : i32
    return %c0_i32, %c0_i32_0 : i32, i32
  }
  func.func @transform_3(%arg0: i32) -> (i32, i32, i32) {
    %c0_i32 = arith.constant 0 : i32
    %c0_i32_0 = arith.constant 0 : i32
    %c0_i32_1 = arith.constant 0 : i32
    %c0_i32_2 = arith.constant 0 : i32
    return %c0_i32, %c0_i32_0, %c0_i32_1 : i32, i32, i32
  }
  func.func @transform_4(%arg0: i32) -> (i32, i32, i32) {
    %c0_i32 = arith.constant 0 : i32
    %c0_i32_0 = arith.constant 0 : i32
    %c0_i32_1 = arith.constant 0 : i32
    %c0_i32_2 = arith.constant 0 : i32
    return %c0_i32, %c0_i32_0, %c0_i32_1 : i32, i32, i32
  }
  func.func @transform_5(%arg0: i32) -> (i32, i32, i32) {
    %c0_i32 = arith.constant 0 : i32
    %c0_i32_0 = arith.constant 0 : i32
    %c0_i32_1 = arith.constant 0 : i32
    %c0_i32_2 = arith.constant 0 : i32
    return %c0_i32, %c0_i32_0, %c0_i32_1 : i32, i32, i32
  }
  func.func @transform_6(%arg0: i32) -> (i32, i32, i32) {
    %c0_i32 = arith.constant 0 : i32
    %c0_i32_0 = arith.constant 0 : i32
    %c0_i32_1 = arith.constant 0 : i32
    %c0_i32_2 = arith.constant 0 : i32
    return %c0_i32, %c0_i32_0, %c0_i32_1 : i32, i32, i32
  }
  func.func @transform_7(%arg0: i32) -> (i32, i32, i32) {
    %c0_i32 = arith.constant 0 : i32
    %c0_i32_0 = arith.constant 0 : i32
    %c0_i32_1 = arith.constant 0 : i32
    %c0_i32_2 = arith.constant 0 : i32
    return %c0_i32, %c0_i32_0, %c0_i32_1 : i32, i32, i32
  }
  func.func @transform_8(%arg0: i32) -> (i32, i32, i32) {
    %c0_i32 = arith.constant 0 : i32
    %c0_i32_0 = arith.constant 0 : i32
    %c0_i32_1 = arith.constant 0 : i32
    %c0_i32_2 = arith.constant 0 : i32
    return %c0_i32, %c0_i32_0, %c0_i32_1 : i32, i32, i32
  }
  func.func @transform_9(%arg0: i32) -> (i32, i32, i32) {
    %c0_i32 = arith.constant 0 : i32
    %c0_i32_0 = arith.constant 0 : i32
    %c0_i32_1 = arith.constant 0 : i32
    %c0_i32_2 = arith.constant 0 : i32
    return %c0_i32, %c0_i32_0, %c0_i32_1 : i32, i32, i32
  }
  func.func @transform_10(%arg0: i32) -> (i32, i32, i32) {
    %c0_i32 = arith.constant 0 : i32
    %c0_i32_0 = arith.constant 0 : i32
    %c0_i32_1 = arith.constant 0 : i32
    %c0_i32_2 = arith.constant 0 : i32
    return %c0_i32, %c0_i32_0, %c0_i32_1 : i32, i32, i32
  }
  func.func @transform_11(%arg0: i32) -> (i32, i32, i32) {
    %c0_i32 = arith.constant 0 : i32
    %c0_i32_0 = arith.constant 0 : i32
    %c0_i32_1 = arith.constant 0 : i32
    %c0_i32_2 = arith.constant 0 : i32
    return %c0_i32, %c0_i32_0, %c0_i32_1 : i32, i32, i32
  }
  func.func @transform_12(%arg0: i32) -> (i32, i32, i32) {
    %c0_i32 = arith.constant 0 : i32
    %c0_i32_0 = arith.constant 0 : i32
    %c0_i32_1 = arith.constant 0 : i32
    %c0_i32_2 = arith.constant 0 : i32
    return %c0_i32, %c0_i32_0, %c0_i32_1 : i32, i32, i32
  }
  func.func @transform_13(%arg0: i32) -> (i32, i32, i32) {
    %c0_i32 = arith.constant 0 : i32
    %c0_i32_0 = arith.constant 0 : i32
    %c0_i32_1 = arith.constant 0 : i32
    %c0_i32_2 = arith.constant 0 : i32
    return %c0_i32, %c0_i32_0, %c0_i32_1 : i32, i32, i32
  }
  func.func @transform_14(%arg0: i32) -> (i32, i32, i32) {
    %c0_i32 = arith.constant 0 : i32
    %c0_i32_0 = arith.constant 0 : i32
    %c0_i32_1 = arith.constant 0 : i32
    %c0_i32_2 = arith.constant 0 : i32
    return %c0_i32, %c0_i32_0, %c0_i32_1 : i32, i32, i32
  }
  func.func @transform_15(%arg0: i32) -> (i32, i32) {
    %c0_i32 = arith.constant 0 : i32
    %c0_i32_0 = arith.constant 0 : i32
    %c0_i32_1 = arith.constant 0 : i32
    return %c0_i32, %c0_i32_0 : i32, i32
  }
  func.func @transform_16(%arg0: i32) -> (i32, i32) {
    %c0_i32 = arith.constant 0 : i32
    %c0_i32_0 = arith.constant 0 : i32
    %c0_i32_1 = arith.constant 0 : i32
    return %c0_i32, %c0_i32_0 : i32, i32
  }
  func.func @transform_17(%arg0: i32) -> (i32, i32) {
    %c0_i32 = arith.constant 0 : i32
    %c0_i32_0 = arith.constant 0 : i32
    %c0_i32_1 = arith.constant 0 : i32
    return %c0_i32, %c0_i32_0 : i32, i32
  }
  func.func @transform_18(%arg0: i32) -> (i32, i32) {
    %c0_i32 = arith.constant 0 : i32
    %c0_i32_0 = arith.constant 0 : i32
    %c0_i32_1 = arith.constant 0 : i32
    return %c0_i32, %c0_i32_0 : i32, i32
  }
  func.func @transform_19(%arg0: i32) -> (i32, i32, i32) {
    %c0_i32 = arith.constant 0 : i32
    %c0_i32_0 = arith.constant 0 : i32
    %c0_i32_1 = arith.constant 0 : i32
    return %arg0, %c0_i32, %c0_i32_0 : i32, i32, i32
  }
}

</mosaic_0001>

<bundles_post_ra>
// kernel: tpu_custom_call.1
= control target key start
LH: loop header
LB: loop body
LE: loop exit
PB: predicated region body
PF: predicated region fallthrough
CT: control target
= control target key end

     0   :  { %s5318_s0 = inlined_call_operand.vmem [shape: f32[2,16,96], index: 0, kind: input, shape index: {}]   ;;  %s5319_s1 = inlined_call_operand.vmem [shape: f32[96,32], index: 1, kind: input, shape index: {}]   ;;  %s5320_s2 = inlined_call_operand.hbm [shape: f32[16,32], index: 2, kind: input, shape index: {}]   ;;  %s5321_s3 = inlined_call_operand.vmem [shape: f32[2,32,96], index: 3, kind: input, shape index: {}]   ;;  %s5322_s4 = inlined_call_operand.vmem [shape: f32[2,1,96], index: 4, kind: input, shape index: {}]   ;;  %s5323_s5 = inlined_call_operand.vmem [shape: f32[2,32,32], index: 5, kind: input, shape index: {}]   ;;  %s5324_s6 = inlined_call_operand.vmem [shape: f32[2,1,32], index: 6, kind: input, shape index: {}]   ;;  %s5325_s7 = inlined_call_operand.vmem [shape: f32[2,32,64], index: 7, kind: input, shape index: {}]   ;;  %s5326_s8 = inlined_call_operand.vmem [shape: f32[2,1,64], index: 8, kind: input, shape index: {}]   ;;  %s5327_s9 = inlined_call_operand.vmem [shape: f32[2,64,32], index: 9, kind: input, shape index: {}]   ;;  %s5328_s10 = inlined_call_operand.vmem [shape: f32[2,1,32], index: 10, kind: input, shape index: {}]   ;;  %s5329_s11 = inlined_call_operand.vmem [shape: f32[2,1,32], index: 11, kind: input, shape index: {}]   ;;  %s5330_s12 = inlined_call_operand.vmem [shape: f32[2,1,32], index: 12, kind: input, shape index: {}]   ;;  %s5331_s13 = inlined_call_operand.vmem [shape: f32[2,1,32], index: 13, kind: input, shape index: {}]   ;;  %s5332_s14 = inlined_call_operand.vmem [shape: f32[2,1,32], index: 14, kind: input, shape index: {}]   ;;  %s5333_s15 = inlined_call_operand.vmem [shape: f32[1,32], index: 15, kind: input, shape index: {}]   ;;  %s5334_s16 = inlined_call_operand.vmem [shape: f32[1,32], index: 16, kind: input, shape index: {}]   ;;  %s5335_s17 = inlined_call_operand.vmem [shape: f32[32,128], index: 17, kind: input, shape index: {}]   ;;  %s5336_s18 = inlined_call_operand.vmem [shape: f32[1,128], index: 18, kind: input, shape index: {}]   ;;  %s5337_s19 = inlined_call_operand.hbm [shape: f32[2,1,128], index: 19, kind: output, shape index: {}]  }
   0x1   :  { %5364 = sst [smem:[#allocation14_spill]] %s5318_s0 }
   0x2   :  { %5365 = sst [smem:[#allocation15_spill]] %s5319_s1 }
   0x3   :  { %5366 = sst [smem:[#allocation16_spill]] %s5320_s2 }
   0x4   :  { %5367 = sst [smem:[#allocation17_spill]] %s5321_s3 }
   0x5   :  { %5368 = sst [smem:[#allocation18_spill]] %s5336_s18 }
   0x6   :  { %5369 = sst [smem:[#allocation19_spill]] %s5337_s19 }
   0x7   :  { %24 = vsyncpa [#allocation3], 0 }
   0x8   :  { %25 = vsyncpa [#allocation4], 0 }
   0x9   :  { %27 = vsyncpa [#allocation4 + $0x1], 0  ;;  %s4656_s0 = smov 0   ;;  %s4658_s30 = smov 0  }
   0xa   :  { %s4660_s20 = smov 0   ;;  %s4662_s21 = smov 0  }
   0xb LB: > { %5370 = sst [smem:[#allocation8_spill]] %s4527_s0  ;;  %s4677_s1 = sadd.s32 4294967295, %s4539_s21   ;;  %s4539_s21 = sphi %s4662_s21, %s5402_s21   ;;  %s4535_s20 = sphi %s4660_s20, %s5404_s20   ;;  %s4531_s30 = sphi %s4658_s30, %s5406_s30   ;;  %s4527_s0 = sphi %s4656_s0, %s5405_s0  }
   0xc   : > { %5371 = sst [smem:[#allocation9_spill]] %s4535_s20  ;;  %s3516_s22 = sadd.s32 4294967294, %s4539_s21  }
   0xd   : > { %5372 = sst [smem:[#allocation10_spill]] %s4539_s21  ;;  %s4681_s2 = sadd.s32 1, %s4539_s21  }
   0xe   : > { %5373 = sst [smem:[#allocation11_spill]] %s4681_s2  ;;  %s444_s23 = sadd.s32 1, %s4535_s20 }
   0xf   : > { %s441_s24 = ssub.s32 %s4539_s21, %s4681_s2  ;;  %p454_p0 = scmp.ne.s32.totalorder %s4535_s20, %s4531_s30 }
  0x10   : > { %p442_p1 = scmp.eq.s32.totalorder %s441_s24, 0  ;;  %p455_p2 = scmp.eq.s32.totalorder %s4677_s1, 1 }
  0x11   : > { %p460_p3 = scmp.ne.s32.totalorder %s4531_s30, %s4527_s0  ;;  %p461_p4 = scmp.eq.s32.totalorder %s3516_s22, 1 }
  0x12   : > { %s4692_s25 = scalar_select %p442_p1, %s4535_s20, %s444_s23  }
  0x13   : > { %p4694_p5 = por %p455_p2, %p454_p0  ;;  %p4698_p6 = por %p461_p4, %p460_p3 }
  0x14   : > { %5374 = sst [smem:[#allocation12_spill]] %s4692_s25  ;;  %p3517_p7 = scmp.ge.s32.totalorder %s4539_s21, 1 }
  0x15   : > { %s5375_s3 = scalar_select %p4694_p5, 1, 0 }
  0x16   : > { %s5376_s26 = scalar_select %p4698_p6, 1, 0 }
  0x17   : > { %p468_p8 = scmp.lt.s32.totalorder %s4539_s21, 3  ;;  %p5347_p9 = scmp.eq.s32.totalorder %s4677_s1, 0 }
  0x18   : > { %5377 = sst [smem:[#allocation13_spill]] %s5376_s26  ;;  %s4541_s28 = smov [#allocation2]  }
  0x19   : > { %p4705_p10 = pnand %p3517_p7, %p468_p8  ;;  %s483_s29 = sshll.u32 %s4541_s28, 4  ;;  %s484_s29 = int_to_ptr.vmem [resolvable:$true] %s483_s29 }
  0x1a   : > { %s5380_s25 = sld [smem:[#allocation16_spill]] }
  0x1b   : > { %s5378_s27 = scalar_select %p4705_p10, 1, 0 }
  0x1c   : > { %p4228_p11 = pneg %p4705_p10 }
  0x1e   : > { %p4713_p12 = pnand %p5347_p9, %p4228_p11 }
  0x20   : > { %s4445_s20 = scalar_lea.hbm %s5380_s25, 256  ;;  %p4447_p0 = pneg %p4713_p12 }
  0x21   : > { %p4446_p13 = scmp.ne.s32.totalorder %s5380_s25, %s4445_s20  ;;  %p4452_p3 = scmp.lt.u32.totalorder %s4445_s20, %s5380_s25 }
  0x23   : > { %p4448_p1 = pnand %p4447_p0, %p4446_p13 }
  0x25   : > { %p4449_p2 = pneg %p4448_p1 }
  0x27   : > { %p4454_p4 = pnand %p4452_p3, %p4449_p2 }
  0x29   : > { %4457 = shalt.err (!%p4454_p4)
}
  0x2a   : > { %s4458_s21 = scalar_lea.vmem %s484_s29, 256  ;;  %p4466_p9 = scmp.lt.s32.totalorder %s484_s29, %s484_s29 }
  0x2b   : > { %p4459_p7 = scmp.ne.s32.totalorder %s484_s29, %s4458_s21  ;;  %p4467_p6 = scmp.lt.s32.totalorder %s4458_s21, %s4458_s21 }
  0x2d   : > { %p4461_p8 = pnand %p4459_p7, %p4447_p0  ;;  %p4468_p5 = por %p4467_p6, %p4466_p9 }
  0x2f   : > { %p4462_p11 = pneg %p4461_p8 }
  0x31   : > { %p4469_p10 = pnand %p4468_p5, %p4462_p11 }
  0x33   : > { %4472 = shalt.err (!%p4469_p10)
}
  0x34   : > { %s4542_s2 = smov 128   ;;  %s4543_s26 = smov 8  }
  0x35   : > { %4231 = dma.hbm_to_vmem [thread:$0]  (!%p4713_p12), %s5380_s25, 256, %s484_s29, [#allocation3], %s4542_s2, %s4542_s2, %s4543_s26  }
  0x36   : > { %p5381_p13 = scmp.ne.s32.totalorder %s5378_s27, 0 }
  0x37   : > { %p5382_p1 = scmp.eq.s32.totalorder (!%p5381_p13), %s4677_s1, 0 }
  0x38   : > { %555 = sbr.rel (%p5381_p13) target bundleno = 6186 (0x182a), region = 96 }
  0x3f   : > { %4518 = dma.done.wait (%p5382_p1), [#allocation3], 256   ;;  %p5383_p0 = pmov %p5382_p1 }
  0x40   : > { %p610_p5 = scmp.lt.s32.totalorder %s4677_s1, 1  ;;  %s5384_s28 = sld [smem:[#allocation15_spill]]  ;;  %vm631_vm0 = vcmask 785408   ;;  %v629_v26 = vld [vmem:[#allocation2] sm:$0xff]  ;;  %v630_v27 = vld [vmem:[#allocation2 + $0x8] sm:$0xff]  ;;  %vm727_vm1 = vcmask 261120  }
  0x41   : > { %4520 = vsyncadd (%p5383_p0), [#allocation3], 4294967040  ;;  %s5386_s26 = sld [smem:[#allocation17_spill]]  ;;  %v3526_v32 = vld [vmem:[%s5322_s4] ss:$0 sm:$0xff]  ;;  %vm827_vm2 = vcmask 64512  }
  0x42   : > { %s611_s0 = scalar_select %p610_p5, %s4677_s1, 1  ;;  %vm4835_vm3 = vmpackc.low %vm827_vm2, %vm827_vm2  ;;  %vm1190_vm5 = vcmask 130048   ;;  %vm1655_vm6 = vcmask 195584   ;;  %vm1906_vm7 = vcmask 523264   ;;  %vm3341_vm8 = vcmask 253952  }
  0x43   : > { %s4544_s29 = smov 112   ;;  %s4545_s27 = smov 120   ;;  %vm4553_vm9 = vmmov 0  }
  0x44   : > { %s3638_s20 = sshll.u32 %s611_s0, 4  ;;  %s5385_s0 = sld [smem:[#allocation14_spill]] }
  0x45   : > { %s5362_s2 = smov 104   ;;  %s5360_s19 = smov 96  }
  0x46   : > { %v617_v0 = vld [vmem:[%s5384_s28] sm:$0xff]  ;;  %v618_v1 = vld [vmem:[%s5384_s28 + $0x8] sm:$0xff]  ;;  %v619_v2 = vld [vmem:[%s5384_s28 + $0x10] sm:$0xff]  ;;  %s5352_s25 = smov 64   ;;  %s5356_s24 = smov 16  }
  0x47   : > { %v4032_v3 = vpack.c.bf16 %v618_v1, %v617_v0  ;;  %v620_v4 = vld [vmem:[%s5384_s28 + $0x18] sm:$0xff]  ;;  %v621_v6 = vld [vmem:[%s5384_s28 + $0x20] sm:$0xff]  ;;  %v622_v7 = vld [vmem:[%s5384_s28 + $0x28] sm:$0xff]  ;;  %v713_v0 = vlaneseq  ;;  %s5392_s21 = smov 8   ;;  %s608_s22 = sand.u32 1, %s4531_s30  }
  0x48   : > { %v4036_v5 = vpack.c.bf16 %v620_v4, %v619_v2  ;;  %v716_v9 = vld [vmem:[%s5386_s26] sm:$0xff]  ;;  %v4040_v10 = vpack.c.bf16 %v622_v7, %v621_v6  ;;  %v717_v11 = vld [vmem:[%s5386_s26 + $0x8] sm:$0xff]  ;;  %v623_v12 = vld [vmem:[%s5384_s28 + $0x30] sm:$0xff]  ;;  %s3635_s23 = sshll.u32 %s4677_s1, 4  ;;  %p5397_p9 = scmp.ne.s32.totalorder %s5375_s3, 0 }
  0x49   : > { %4033 = vmatprep.subr.bf16.mxu0 %v4032_v3  ;;  %v624_v13 = vld [vmem:[%s5384_s28 + $0x38] sm:$0xff]  ;;  %v4056_v14 = vpack.c.bf16 %v717_v11, %v716_v9  ;;  %v625_v16 = vld [vmem:[%s5384_s28 + $0x40] sm:$0xff]  ;;  %v626_v17 = vld [vmem:[%s5384_s28 + $0x48] sm:$0xff]  ;;  %v4861_v1 = vand.u32 127, %v713_v0  ;;  %s4555_s1 = smov [#allocation5]  }
  0x4a   : > { %s4756_s18 = scalar_lea.vmem %s5385_s0, %s3638_s20  ;;  %4035 = vmatpush3.bf16.msra.mxu0 %v4032_v3  ;;  %v4044_v15 = vpack.c.bf16 %v624_v13, %v623_v12  ;;  %v4048_v18 = vpack.c.bf16 %v626_v17, %v625_v16  ;;  %v627_v19 = vld [vmem:[%s5384_s28 + $0x50] sm:$0xff]  ;;  %v628_v20 = vld [vmem:[%s5384_s28 + $0x58] sm:$0xff]  ;;  %s5358_s20 = smov 8  }
  0x4b   : > { %v615_v8 = vld [vmem:[%s4756_s18] sm:$0xff]  ;;  %4037 = vmatprep.subr.bf16.mxu0 %v4036_v5  ;;  %4057 = vmatprep.subr.bf16.mxu1 %v4056_v14  ;;  %v4052_v21 = vpack.c.bf16 %v628_v20, %v627_v19  ;;  %v616_v22 = vld [vmem:[%s4756_s18 + $0x8] sm:$0xff]  ;;  %v718_v23 = vld [vmem:[%s5386_s26 + $0x10] sm:$0xff]  ;;  %vm715_vm4 = vcmp.lt.s32.totalorder %v4861_v1, 9  ;;  %s609_s0 = scalar_lea.vmem [#allocation5], %s608_s22 }
  0x4c   : > { %3802 = vmatprep.mubr.msk.f32.mxu0 %vm631_vm0, %v615_v8  ;;  %4059 = vmatpush3.bf16.msra.mxu1 %v4056_v14  ;;  %v719_v24 = vld [vmem:[%s5386_s26 + $0x18] sm:$0xff] }
  0x4d   : > { %v4060_v25 = vpack.c.bf16 %v719_v24, %v718_v23 }
  0x4e   : > { %4039 = vmatpush3.bf16.msra.mxu0 %v4036_v5 }
  0x4f   : > { %4041 = vmatprep.subr.bf16.mxu0 %v4040_v10  ;;  %4061 = vmatprep.subr.bf16.mxu1 %v4060_v25 }
  0x50   : > { %4063 = vmatpush3.bf16.msra.mxu1 %v4060_v25 }
  0x52   : > { %4043 = vmatpush3.bf16.msra.mxu0 %v4040_v10 }
  0x53   : > { %4045 = vmatprep.subr.bf16.mxu0 %v4044_v15 }
  0x56   : > { %4047 = vmatpush3.bf16.msra.mxu0 %v4044_v15 }
  0x57   : > { %4049 = vmatprep.subr.bf16.mxu0 %v4048_v18 }
  0x5a   : > { %4051 = vmatpush3.bf16.msra.mxu0 %v4048_v18 }
  0x5b   : > { %4053 = vmatprep.subr.bf16.mxu0 %v4052_v21 }
  0x5e   : > { %4055 = vmatpush3.bf16.msra.mxu0 %v4052_v21 }
  0x61   : > { %3803 = vmatmul.mubr.msk.f32.vlgmr.msra.gmra.mrb[0].mxu0 %vm631_vm0, %v616_v22 }
 0x134   : > { %v3804_v28 = vpop.f32.mrb[0].mxu0 }
 0x135   : > { %v704_v29 = vpop.f32.mrb[1].mxu0  ;;  %v4800_v31 = vadd.f32 %v3804_v28, %v630_v27 }
 0x136   : > { %v4798_v30 = vadd.f32 %v704_v29, %v629_v26 }
 0x138   : > { %3813 = vmatprep.mubr.msk.f32.mxu1 %vm727_vm1, %v4798_v30 }
 0x139   : > { %3814 = vmatmul.mubr.msk.f32.vlgmr.msra.gmra.mrb[0].mxu1 %vm727_vm1, %v4800_v31 }
 0x20c   : > { %v3815_v33 = vpop.f32.mrb[0].mxu1 }
 0x20d   : > { %v806_v34 = vadd.f32 %v3815_v33, %v3526_v32  ;;  %v800_v35 = vpop.f32.mrb[1].mxu1 }
 0x20e   : > { %v801_v36 = vadd.f32 %v3526_v32, %v800_v35 }
 0x20f   : > { %817 = vrot.lane.b32.xlu1 %v806_v34, %s4544_s29 }
 0x210   : > { %811 = vrot.lane.b32.xlu0 %v801_v36, %s4545_s27  ;;  %3820 = vmatprep.mubr.msk.f32.mxu1 %vm827_vm2, %v801_v36  ;;  %v4816_v37 = vpack.i.bf16 %v806_v34, %v801_v36 }
 0x213   : > { %815 = vrot.lane.b32.xlu1 %v801_v36, %s4544_s29 }
 0x214   : > { %813 = vrot.lane.b32.xlu0 %v806_v34, %s4545_s27 }
 0x217   : > { %821 = vrot.lane.b32.xlu1 %v806_v34, %s5362_s2 }
 0x218   : > { %819 = vrot.lane.b32.xlu0 %v801_v36, %s5362_s2  ;;  %s4477_s2 = sshll.u32 %s4555_s1, 4  ;;  %s4478_s2 = int_to_ptr.vmem [resolvable:$false] %s4477_s2 }
 0x21c   : > { %4286 = vrot.lane.b32.xlu0 %v4816_v37, %s5360_s19 }
 0x281   : > { %v818_v38 = vpop.permute.xlu1 %817 }
 0x282   : > { %v812_v39 = vpop.permute.xlu0 %811 }
 0x285   : > { %v816_v40 = vpop.permute.xlu1 %815 }
 0x286   : > { %v4820_v41 = vpack.i.bf16 %v818_v38, %v816_v40  ;;  %3834 = vmatprep.mubr.msk.f32.mxu0 %vm827_vm2, %v816_v40  ;;  %v814_v42 = vpop.permute.xlu0 %813 }
 0x287   : > { %v4823_v43 = vpack.i.bf16 %v814_v42, %v812_v39 }
 0x288   : > { %4296 = vrot.lane.b32.xlu0 %v4820_v41, %s5360_s19 }
 0x289   : > { %v822_v44 = vpop.permute.xlu1 %821  ;;  %4291 = vrot.lane.b32.xlu1 %v4823_v43, %s5360_s19 }
 0x28a   : > { %v820_v45 = vpop.permute.xlu0 %819 }
 0x28b   : > { %v4829_v46 = vpack.i.bf16 %v822_v44, %v820_v45 }
 0x28d   : > { %4301 = vrot.lane.b32.xlu1 %v4829_v46, %s5360_s19  ;;  %s5395_s19 = sld [smem:[#allocation18_spill]] }
 0x28e   : > { %v4287_v47 = vpop.permute.xlu0 %4286 }
 0x28f   : > { %v4289_v48 = vunpack.i.h.bf16 %v4287_v47  ;;  %v4288_v49 = vunpack.i.l.bf16 %v4287_v47 }
 0x291   : > { %v4064_v51 = vpack.c.bf16 %v4289_v48, %v4288_v49 }
 0x293   : > { %4066 = vmatprep.subr.msk.bf16.mxu1 %vm4835_vm3, %v4064_v51 }
 0x294   : > { %4069 = vmatpush3.bf16.xpose.msk.msra.mxu1 %vm4835_vm3, %v4064_v51 }
 0x29b   : > { %3821 = vmatmul.mubr.msk.f32.vlgmr.msra.gmra.mrb[2].mxu1 %vm827_vm2, %v806_v34 }
 0x29c   : > { %3827 = vmatprep.mubr.msk.f32.mxu1 %vm827_vm2, %v812_v39 }
 0x2fa   : > { %v4297_v52 = vpop.permute.xlu0 %4296 }
 0x2fb   : > { %v4299_v53 = vunpack.i.h.bf16 %v4297_v52  ;;  %v4298_v54 = vunpack.i.l.bf16 %v4297_v52  ;;  %v4292_v55 = vpop.permute.xlu1 %4291 }
 0x2fc   : > { %v4294_v56 = vunpack.i.h.bf16 %v4292_v55  ;;  %v4293_v57 = vunpack.i.l.bf16 %v4292_v55 }
 0x2fd   : > { %v4076_v58 = vpack.c.bf16 %v4299_v53, %v4298_v54 }
 0x2fe   : > { %v4070_v59 = vpack.c.bf16 %v4294_v56, %v4293_v57 }
 0x2ff   : > { %v4302_v60 = vpop.permute.xlu1 %4301  ;;  %4078 = vmatprep.subr.msk.bf16.mxu0 %vm4835_vm3, %v4076_v58 }
 0x300   : > { %v4304_v61 = vunpack.i.h.bf16 %v4302_v60  ;;  %v4303_v62 = vunpack.i.l.bf16 %v4302_v60  ;;  %4072 = vmatprep.subr.msk.bf16.mxu1 %vm4835_vm3, %v4070_v59  ;;  %4081 = vmatpush3.bf16.xpose.msk.msra.mxu0 %vm4835_vm3, %v4076_v58 }
 0x301   : > { %4075 = vmatpush3.bf16.xpose.msk.msra.mxu1 %vm4835_vm3, %v4070_v59 }
 0x302   : > { %v4082_v63 = vpack.c.bf16 %v4304_v61, %v4303_v62 }
 0x304   : > { %4084 = vmatprep.subr.msk.bf16.mxu1 %vm4835_vm3, %v4082_v63 }
 0x307   : > { %3835 = vmatmul.mubr.msk.f32.vlgmr.msra.gmra.mrb[2].mxu0 %vm827_vm2, %v818_v38 }
 0x308   : > { %3828 = vmatmul.mubr.msk.f32.vlgmr.msra.gmra.mrb[4].mxu1 %vm827_vm2, %v814_v42 }
 0x309   : > { %4087 = vmatpush3.bf16.xpose.msk.msra.mxu1 %vm4835_vm3, %v4082_v63  ;;  %3841 = vmatprep.mubr.msk.f32.mxu1 %vm827_vm2, %v820_v45 }
 0x310   : > { %3842 = vmatmul.mubr.msk.f32.vlgmr.msra.gmra.mrb[6].mxu1 %vm827_vm2, %v822_v44 }
 0x36e   : > { %v3822_v2 = vpop.f32.mrb[2].mxu1 }
 0x36f   : > { %v1173_v3 = vmul.f32 0.35355338, %v3822_v2  ;;  %v902_v4 = vpop.f32.mrb[3].mxu1 }
 0x370   : > { %v1172_v5 = vmul.f32 0.35355338, %v902_v4 }
 0x371   : > { %v1183_v6 = vsel %vm715_vm4, %v1173_v3, -1e+30 }
 0x372   : > { %v1194_v7 = vsel %vm1190_vm5, %v1183_v6, -inf  ;;  %v1182_v8 = vsel %vm715_vm4, %v1172_v5, -1e+30 }
 0x373   : > { %1195 = vmax.xlane.f32.xlu1 %v1194_v7  ;;  %v1191_v9 = vsel %vm1190_vm5, %v1182_v8, -inf }
 0x374   : > { %1192 = vmax.xlane.f32.xlu0 %v1191_v9 }
 0x3da   : > { %v3836_v10 = vpop.f32.mrb[2].mxu0 }
 0x3db   : > { %v3829_v11 = vpop.f32.mrb[4].mxu1  ;;  %v1076_v12 = vpop.f32.mrb[3].mxu0  ;;  %v1177_v21 = vmul.f32 0.35355338, %v3836_v10 }
 0x3dc   : > { %v1175_v13 = vmul.f32 0.35355338, %v3829_v11  ;;  %v1176_v14 = vmul.f32 0.35355338, %v1076_v12  ;;  %v989_v15 = vpop.f32.mrb[5].mxu1 }
 0x3dd   : > { %v1174_v16 = vmul.f32 0.35355338, %v989_v15  ;;  %v1187_v27 = vsel %vm715_vm4, %v1177_v21, -1e+30 }
 0x3de   : > { %v1186_v17 = vsel %vm715_vm4, %v1176_v14, -1e+30  ;;  %v1185_v18 = vsel %vm715_vm4, %v1175_v13, -1e+30  ;;  %v1206_v29 = vsel %vm1190_vm5, %v1187_v27, -inf }
 0x3df   : > { %v1203_v19 = vsel %vm1190_vm5, %v1186_v17, -inf  ;;  %v1200_v20 = vsel %vm1190_vm5, %v1185_v18, -inf  ;;  %v1184_v22 = vsel %vm715_vm4, %v1174_v16, -1e+30 }
 0x3e0   : > { %1204 = vmax.xlane.f32.xlu1 %v1203_v19  ;;  %1201 = vmax.xlane.f32.xlu0 %v1200_v20  ;;  %v1197_v24 = vsel %vm1190_vm5, %v1184_v22, -inf }
 0x3e3   : > { %v3843_v23 = vpop.f32.mrb[6].mxu1 }
 0x3e4   : > { %v1179_v25 = vmul.f32 0.35355338, %v3843_v23  ;;  %1198 = vmax.xlane.f32.xlu0 %v1197_v24  ;;  %v1163_v26 = vpop.f32.mrb[7].mxu1 }
 0x3e5   : > { %v1178_v28 = vmul.f32 0.35355338, %v1163_v26 }
 0x3e6   : > { %v1189_v34 = vsel %vm715_vm4, %v1179_v25, -1e+30 }
 0x3e7   : > { %v4884_v32 = vsel %vm715_vm4, %v1178_v28, -1e+30  ;;  %v1212_v35 = vsel %vm1190_vm5, %v1189_v34, -inf }
 0x3e8   : > { %1207 = vmax.xlane.f32.xlu0 %v1206_v29  ;;  %v1209_v33 = vsel %vm1190_vm5, %v4884_v32, -inf }
 0x3e9   : > { %1210 = vmax.xlane.f32.xlu1 %v1209_v33 }
 0x3ec   : > { %1213 = vmax.xlane.f32.xlu0 %v1212_v35 }
 0x3fa   : > { %4306 = vrot.lane.b32.xlu1 %v4816_v37, %s5352_s25 }
 0x400   : > { %v1196_v36 = vpop.xlane.xlu1 %1195 }
 0x401   : > { %v1216_v38 = vsub.f32 %v1183_v6, %v1196_v36  ;;  %v1193_v40 = vpop.xlane.xlu0 %1192 }
 0x402   : > { %v1215_v42 = vsub.f32 %v1182_v8, %v1193_v40 }
 0x403   : > { %v1225_v39 = vmul.f32 1.442695, %v1216_v38 }
 0x404   : > { %v1223_v44 = vmul.f32 1.442695, %v1215_v42 }
 0x405   : > { %4365 = vpow2.f32 %v1225_v39 }
 0x406   : > { %4367 = vpow2.f32 %v1223_v44 }
 0x40f   : > { %v4366_v45 = vpop.eup %4365 }
 0x410   : > { %v1242_v47 = vsel %vm1190_vm5, %v4366_v45, 0.0  ;;  %v4368_v48 = vpop.eup %4367 }
 0x411   : > { %1243 = vadd.xlane.f32.xlu0 %v1242_v47  ;;  %v1239_v49 = vsel %vm1190_vm5, %v4368_v48, 0.0 }
 0x41e   : > { %1240 = vadd.xlane.f32.xlu1 %v1239_v49 }
 0x46d   : > { %v1205_v51 = vpop.xlane.xlu1 %1204  ;;  %v1202_v52 = vpop.xlane.xlu0 %1201 }
 0x46e   : > { %v1218_v53 = vsub.f32 %v1185_v18, %v1202_v52  ;;  %v1219_v37 = vsub.f32 %v1186_v17, %v1205_v51 }
 0x470   : > { %v1229_v54 = vmul.f32 1.442695, %v1218_v53  ;;  %v1231_v57 = vmul.f32 1.442695, %v1219_v37 }
 0x471   : > { %v1199_v55 = vpop.xlane.xlu0 %1198 }
 0x472   : > { %v1217_v56 = vsub.f32 %v1184_v22, %v1199_v55  ;;  %4369 = vpow2.f32 %v1229_v54 }
 0x474   : > { %v1227_v58 = vmul.f32 1.442695, %v1217_v56 }
 0x475   : > { %v1208_v59 = vpop.xlane.xlu0 %1207 }
 0x476   : > { %4371 = vpow2.f32 %v1227_v58  ;;  %v1220_v60 = vsub.f32 %v1187_v27, %v1208_v59  ;;  %v1211_v61 = vpop.xlane.xlu1 %1210 }
 0x477   : > { %4373 = vpow2.f32 %v1231_v57  ;;  %v1221_v17 = vsub.f32 %v4884_v32, %v1211_v61 }
 0x478   : > { %v1233_v62 = vmul.f32 1.442695, %v1220_v60 }
 0x479   : > { %v1214_v63 = vpop.xlane.xlu0 %1213  ;;  %v1235_v19 = vmul.f32 1.442695, %v1221_v17 }
 0x47a   : > { %4375 = vpow2.f32 %v1233_v62  ;;  %v1222_v0 = vsub.f32 %v1189_v34, %v1214_v63  ;;  %v4307_v2 = vpop.permute.xlu1 %4306  ;;  %v1658_v62 = vld [vmem:[%s5323_s5] sm:$0xff]  ;;  %v1659_v63 = vld [vmem:[%s5323_s5 + $0x8] sm:$0xff] }
 0x47b   : > { %v4309_v3 = vunpack.i.h.bf16 %v4307_v2  ;;  %v4308_v4 = vunpack.i.l.bf16 %v4307_v2  ;;  %v4104_v2 = vpack.c.bf16 %v1659_v63, %v1658_v62 }
 0x47c   : > { %v1237_v5 = vmul.f32 1.442695, %v1222_v0  ;;  %v4895_v6 = vpop.eup %4369  ;;  %v1660_v0 = vld [vmem:[%s5323_s5 + $0x10] sm:$0xff] }
 0x47d   : > { %v4088_v7 = vpack.c.bf16 %v4309_v3, %v4308_v4  ;;  %v1248_v8 = vsel %vm1190_vm5, %v4895_v6, 0.0  ;;  %v1661_v3 = vld [vmem:[%s5323_s5 + $0x18] sm:$0xff] }
 0x47e   : > { %4377 = vpow2.f32 %v1237_v5  ;;  %1249 = vadd.xlane.f32.xlu0 %v1248_v8  ;;  %v4108_v4 = vpack.c.bf16 %v1661_v3, %v1660_v0 }
 0x47f   : > { %4089 = vmatprep.subr.bf16.mxu1 %v4088_v7 }
 0x480   : > { %v4372_v9 = vpop.eup %4371  ;;  %4091 = vmatpush3.bf16.msra.mxu1 %v4088_v7 }
 0x481   : > { %v1245_v10 = vsel %vm1190_vm5, %v4372_v9, 0.0  ;;  %v4374_v11 = vpop.eup %4373 }
 0x482   : > { %1246 = vadd.xlane.f32.xlu1 %v1245_v10  ;;  %v1251_v14 = vsel %vm1190_vm5, %v4374_v11, 0.0 }
 0x484   : > { %v4376_v12 = vpop.eup %4375 }
 0x485   : > { %v1254_v13 = vsel %vm1190_vm5, %v4376_v12, 0.0 }
 0x486   : > { %1255 = vadd.xlane.f32.xlu0 %v1254_v13  ;;  %1252 = vadd.xlane.f32.xlu1 %v1251_v14 }
 0x488   : > { %v4902_v15 = vpop.eup %4377 }
 0x489   : > { %v1260_v16 = vsel %vm1190_vm5, %v4902_v15, 0.0 }
 0x48a   : > { %1261 = vadd.xlane.f32.xlu0 %v1260_v16 }
 0x497   : > { %4316 = vrot.lane.b32.xlu1 %v4820_v41, %s5352_s25 }
 0x49e   : > { %v1244_v18 = vpop.xlane.xlu0 %1243 }
 0x49f   : > { %4379 = vrcp.f32 %v1244_v18 }
 0x4a0   : > { %4311 = vrot.lane.b32.xlu0 %v4823_v43, %s5352_s25 }
 0x4a9   : > { %v4380_v21 = vpop.eup %4379 }
 0x4aa   : > { %v1272_v25 = vmul.f32 %v4380_v21, %v4366_v45 }
 0x4ab   : > { %v1241_v20 = vpop.xlane.xlu1 %1240 }
 0x4ac   : > { %4381 = vrcp.f32 %v1241_v20 }
 0x4ad   : > { %4383 = vpow2.f32 %v1235_v19 }
 0x4b6   : > { %v4382_v22 = vpop.eup %4381 }
 0x4b7   : > { %v4384_v23 = vpop.eup %4383  ;;  %v1271_v24 = vmul.f32 %v4382_v22, %v4368_v48 }
 0x4b8   : > { %v1257_v41 = vsel %vm1190_vm5, %v4384_v23, 0.0 }
 0x4b9   : > { %3848 = vmatprep.mubr.msk.f32.mxu1 %vm1190_vm5, %v1271_v24 }
 0x4ba   : > { %3849 = vmatmul.mubr.msk.f32.vlgmr.msra.gmra.mrb[8].mxu1 %vm1190_vm5, %v1272_v25 }
 0x4bb   : > { %1258 = vadd.xlane.f32.xlu1 %v1257_v41 }
 0x4cc   : > { %4321 = vrot.lane.b32.xlu1 %v4829_v46, %s5352_s25  ;;  %s5354_s25 = smov 24  }
 0x50b   : > { %v1250_v43 = vpop.xlane.xlu0 %1249 }
 0x50f   : > { %v1247_v26 = vpop.xlane.xlu1 %1246 }
 0x510   : > { %4385 = vrcp.f32 %v1247_v26 }
 0x511   : > { %4387 = vrcp.f32 %v1250_v43 }
 0x513   : > { %v1256_v27 = vpop.xlane.xlu0 %1255  ;;  %v1253_v28 = vpop.xlane.xlu1 %1252 }
 0x514   : > { %4389 = vrcp.f32 %v1256_v27 }
 0x515   : > { %4391 = vrcp.f32 %v1253_v28 }
 0x517   : > { %v1262_v29 = vpop.xlane.xlu0 %1261  ;;  %v4317_v32 = vpop.permute.xlu1 %4316 }
 0x518   : > { %v4319_v33 = vunpack.i.h.bf16 %v4317_v32  ;;  %v4318_v34 = vunpack.i.l.bf16 %v4317_v32  ;;  %4393 = vrcp.f32 %v1262_v29 }
 0x51a   : > { %v4386_v35 = vpop.eup %4385  ;;  %v4096_v36 = vpack.c.bf16 %v4319_v33, %v4318_v34 }
 0x51b   : > { %v4312_v38 = vpop.permute.xlu0 %4311  ;;  %v1273_v39 = vmul.f32 %v4386_v35, %v4372_v9  ;;  %v4388_v46 = vpop.eup %4387 }
 0x51c   : > { %v4314_v40 = vunpack.i.h.bf16 %v4312_v38  ;;  %v4313_v42 = vunpack.i.l.bf16 %v4312_v38  ;;  %4097 = vmatprep.subr.bf16.mxu0 %v4096_v36  ;;  %v1274_v51 = vmul.f32 %v4388_v46, %v4895_v6  ;;  %v1798_v46 = vld [vmem:[%s5325_s7 + $0x8] sm:$0xff] }
 0x51d   : > { %3855 = vmatprep.mubr.msk.f32.mxu1 %vm1190_vm5, %v1273_v39  ;;  %4099 = vmatpush3.bf16.msra.mxu0 %v4096_v36 }
 0x51e   : > { %v4390_v44 = vpop.eup %4389  ;;  %v4092_v45 = vpack.c.bf16 %v4314_v40, %v4313_v42  ;;  %4105 = vmatprep.subr.bf16.mxu0 %v4104_v2 }
 0x51f   : > { %v4392_v47 = vpop.eup %4391  ;;  %v1276_v48 = vmul.f32 %v4390_v44, %v4376_v12 }
 0x520   : > { %4093 = vmatprep.subr.bf16.mxu1 %v4092_v45  ;;  %v1275_v49 = vmul.f32 %v4392_v47, %v4374_v11  ;;  %v1800_v47 = vld [vmem:[%s5325_s7 + $0x18] sm:$0xff] }
 0x521   : > { %4095 = vmatpush3.bf16.msra.mxu1 %v4092_v45  ;;  %v1799_v45 = vld [vmem:[%s5325_s7 + $0x10] sm:$0xff] }
 0x522   : > { %3862 = vmatprep.mubr.msk.f32.mxu0 %vm1190_vm5, %v1275_v49  ;;  %v4394_v56 = vpop.eup %4393  ;;  %v1891_v49 = vld [vmem:[%s5327_s9] sm:$0xff] }
 0x523   : > { %3863 = vmatmul.mubr.msk.f32.vlgmr.msra.gmra.mrb[4].mxu0 %vm1190_vm5, %v1276_v48  ;;  %v1278_v59 = vmul.f32 %v4394_v56, %v4902_v15  ;;  %v4116_v48 = vpack.c.bf16 %v1800_v47, %v1799_v45  ;;  %v1896_v56 = vld [vmem:[%s5327_s9 + $0x28] sm:$0xff] }
 0x524   : > { %3856 = vmatmul.mubr.msk.f32.vlgmr.msra.gmra.mrb[10].mxu1 %vm1190_vm5, %v1274_v51  ;;  %4107 = vmatpush3.bf16.msra.mxu0 %v4104_v2  ;;  %v1892_v51 = vld [vmem:[%s5327_s9 + $0x8] sm:$0xff]  ;;  %v3556_v2 = vld [vmem:[%s5329_s11] ss:$0 sm:$0xff] }
 0x525   : > { %4109 = vmatprep.subr.bf16.mxu0 %v4108_v4 }
 0x528   : > { %4111 = vmatpush3.bf16.msra.mxu0 %v4108_v4  ;;  %v3557_v4 = vld [vmem:[%s5330_s12] ss:$0 sm:$0xff] }
 0x548   : > { %v1259_v52 = vpop.xlane.xlu1 %1258 }
 0x549   : > { %4395 = vrcp.f32 %v1259_v52  ;;  %v1893_v52 = vld [vmem:[%s5327_s9 + $0x10] sm:$0xff] }
 0x54c   : > { %v4322_v53 = vpop.permute.xlu1 %4321 }
 0x54d   : > { %v4324_v37 = vunpack.i.h.bf16 %v4322_v53  ;;  %v4323_v54 = vunpack.i.l.bf16 %v4322_v53  ;;  %v4120_v53 = vpack.c.bf16 %v1892_v51, %v1891_v49 }
 0x54f   : > { %v4100_v55 = vpack.c.bf16 %v4324_v37, %v4323_v54  ;;  %v1894_v37 = vld [vmem:[%s5327_s9 + $0x18] sm:$0xff]  ;;  %4121 = vmatprep.subr.bf16.mxu0 %v4120_v53 }
 0x550   : > { %v4124_v54 = vpack.c.bf16 %v1894_v37, %v1893_v52 }
 0x551   : > { %4101 = vmatprep.subr.bf16.mxu1 %v4100_v55 }
 0x552   : > { %4103 = vmatpush3.bf16.msra.mxu1 %v4100_v55  ;;  %v1895_v55 = vld [vmem:[%s5327_s9 + $0x20] sm:$0xff] }
 0x553   : > { %v4396_v57 = vpop.eup %4395 }
 0x554   : > { %v1277_v58 = vmul.f32 %v4396_v57, %v4384_v23  ;;  %v3553_v23 = vld [vmem:[%s5324_s6] ss:$0 sm:$0xff]  ;;  %v4128_v57 = vpack.c.bf16 %v1896_v56, %v1895_v55 }
 0x556   : > { %3869 = vmatprep.mubr.msk.f32.mxu1 %vm1190_vm5, %v1277_v58 }
 0x557   : > { %3870 = vmatmul.mubr.msk.f32.vlgmr.msra.gmra.mrb[12].mxu1 %vm1190_vm5, %v1278_v59 }
 0x58d   : > { %v3850_v60 = vpop.f32.mrb[8].mxu1 }
 0x58e   : > { %v1357_v61 = vpop.f32.mrb[9].mxu1 }
 0x5f6   : > { %v3864_v5 = vpop.f32.mrb[4].mxu0 }
 0x5f7   : > { %v1531_v6 = vpop.f32.mrb[5].mxu0  ;;  %v3857_v7 = vpop.f32.mrb[10].mxu1 }
 0x5f8   : > { %1631 = vrot.lane.b32.xlu1 %v3857_v7, %s5358_s20  ;;  %v1444_v8 = vpop.f32.mrb[11].mxu1 }
 0x5f9   : > { %1629 = vrot.lane.b32.xlu0 %v1444_v8, %s5358_s20  ;;  %s5389_s20 = smov 104  }
 0x5fc   : > { %1639 = vrot.lane.b32.xlu1 %v3864_v5, %s5356_s24 }
 0x5fd   : > { %1637 = vrot.lane.b32.xlu0 %v1531_v6, %s5356_s24  ;;  %s5390_s24 = smov 96  }
 0x62a   : > { %v3871_v9 = vpop.f32.mrb[12].mxu1 }
 0x62b   : > { %1647 = vrot.lane.b32.xlu1 %v3871_v9, %s5354_s25  ;;  %v1618_v10 = vpop.f32.mrb[13].mxu1 }
 0x62c   : > { %1645 = vrot.lane.b32.xlu0 %v1618_v10, %s5354_s25  ;;  %s3449_s25 = sshll.u32 %s609_s0, 4  ;;  %s5278_s25 = int_to_ptr.vmem [resolvable:$true] %s3449_s25 }
 0x62d   : > { %s4473_s18 = scalar_lea.vmem %s5278_s25, 16  ;;  %p4480_p2 = scmp.lt.s32.totalorder %s5278_s25, %s4478_s2 }
 0x62e   : > { %p4474_p6 = scmp.ne.s32.totalorder %s5278_s25, %s4473_s18 }
 0x630   : > { %p4475_p10 = pnand %p4474_p6, %p5397_p9 }
 0x632   : > { %p4476_p12 = pneg %p4475_p10 }
 0x66a   : > { %v1632_v11 = vpop.permute.xlu1 %1631 }
 0x66b   : > { %v1630_v12 = vpop.permute.xlu0 %1629  ;;  %v1652_v17 = vsel %vm827_vm2, %v3850_v60, %v1632_v11  ;;  %v1897_v11 = vld [vmem:[%s5327_s9 + $0x30] sm:$0xff] }
 0x66c   : > { %v1651_v15 = vsel %vm827_vm2, %v1357_v61, %v1630_v12  ;;  %v1898_v12 = vld [vmem:[%s5327_s9 + $0x38] sm:$0xff] }
 0x66e   : > { %v1640_v13 = vpop.permute.xlu1 %1639 }
 0x66f   : > { %v1638_v14 = vpop.permute.xlu0 %1637  ;;  %v1654_v20 = vsel %vm1190_vm5, %v1652_v17, %v1640_v13  ;;  %v4132_v13 = vpack.c.bf16 %v1898_v12, %v1897_v11 }
 0x670   : > { %v1653_v18 = vsel %vm1190_vm5, %v1651_v15, %v1638_v14  ;;  %v3558_v14 = vld [vmem:[%s5326_s8] ss:$0 sm:$0xff] }
 0x69d   : > { %v1648_v16 = vpop.permute.xlu1 %1647 }
 0x69e   : > { %v1646_v19 = vpop.permute.xlu0 %1645  ;;  %v1657_v22 = vsel %vm1655_vm6, %v1654_v20, %v1648_v16 }
 0x69f   : > { %v1656_v21 = vsel %vm1655_vm6, %v1653_v18, %v1646_v19 }
 0x6a0   : > { %3880 = vmatprep.mubr.msk.f32.mxu0 %vm727_vm1, %v1656_v21  ;;  %v3561_v21 = vld [vmem:[%s5328_s10] ss:$0 sm:$0xff] }
 0x6a1   : > { %3881 = vmatmul.mubr.msk.f32.vlgmr.msra.gmra.mrb[6].mxu0 %vm727_vm1, %v1657_v22 }
 0x6a2   : > { %4123 = vmatpush3.bf16.msra.mxu0 %v4120_v53 }
 0x6a3   : > { %4125 = vmatprep.subr.bf16.mxu0 %v4124_v54 }
 0x6a6   : > { %4127 = vmatpush3.bf16.msra.mxu0 %v4124_v54  ;;  %v3564_v54 = vld [vmem:[%s5331_s13] ss:$0 sm:$0xff] }
 0x6a7   : > { %4129 = vmatprep.subr.bf16.mxu0 %v4128_v57 }
 0x6aa   : > { %4131 = vmatpush3.bf16.msra.mxu0 %v4128_v57 }
 0x6ab   : > { %4133 = vmatprep.subr.bf16.mxu0 %v4132_v13 }
 0x6ae   : > { %4135 = vmatpush3.bf16.msra.mxu0 %v4132_v13 }
 0x774   : > { %v3882_v24 = vpop.f32.mrb[6].mxu0 }
 0x775   : > { %v1747_v25 = vadd.f32 %v3882_v24, %v3553_v23  ;;  %v1741_v41 = vpop.f32.mrb[7].mxu0 }
 0x776   : > { %v1742_v43 = vadd.f32 %v3553_v23, %v1741_v41 }
 0x777   : > { %v1751_v26 = vadd.f32 %v1747_v25, %v4800_v31 }
 0x778   : > { %v1750_v27 = vadd.f32 %v1742_v43, %v4798_v30  ;;  %v1797_v30 = vld [vmem:[%s5325_s7] sm:$0xff] }
 0x779   : > { %v1757_v28 = vsel %vm727_vm1, %v1751_v26, 0.0  ;;  %v4112_v44 = vpack.c.bf16 %v1798_v46, %v1797_v30  ;;  %v3568_v46 = vld [vmem:[%s5386_s26 + $0x30] sm:$0xff] }
 0x77a   : > { %1758 = vadd.xlane.f32.xlu1 %v1757_v28  ;;  %v1754_v29 = vsel %vm727_vm1, %v1750_v27, 0.0 }
 0x77b   : > { %1755 = vadd.xlane.f32.xlu0 %v1754_v29  ;;  %4113 = vmatprep.subr.bf16.mxu1 %v4112_v44 }
 0x77c   : > { %4115 = vmatpush3.bf16.msra.mxu1 %v4112_v44  ;;  %v3569_v44 = vld [vmem:[%s5386_s26 + $0x38] sm:$0xff] }
 0x77d   : > { %4117 = vmatprep.subr.bf16.mxu1 %v4116_v48  ;;  %v4140_v45 = vpack.c.bf16 %v3569_v44, %v3568_v46 }
 0x780   : > { %4119 = vmatpush3.bf16.msra.mxu1 %v4116_v48 }
 0x807   : > { %v1759_v32 = vpop.xlane.xlu1 %1758 }
 0x808   : > { %v1762_v33 = vmul.f32 0.03125, %v1759_v32  ;;  %v1756_v34 = vpop.xlane.xlu0 %1755 }
 0x809   : > { %v1761_v35 = vmul.f32 0.03125, %v1756_v34 }
 0x80a   : > { %v1764_v36 = vsub.f32 %v1751_v26, %v1762_v33 }
 0x80b   : > { %v1763_v38 = vsub.f32 %v1750_v27, %v1761_v35 }
 0x80c   : > { %v1766_v42 = vmul.f32 %v1764_v36, %v1764_v36 }
 0x80d   : > { %v1765_v39 = vmul.f32 %v1763_v38, %v1763_v38 }
 0x80e   : > { %v1770_v31 = vsel %vm727_vm1, %v1766_v42, 0.0  ;;  %v3566_v42 = vld [vmem:[%s5386_s26 + $0x20] sm:$0xff] }
 0x80f   : > { %v1767_v40 = vsel %vm727_vm1, %v1765_v39, 0.0 }
 0x810   : > { %1768 = vadd.xlane.f32.xlu0 %v1767_v40 }
 0x814   : > { %1771 = vadd.xlane.f32.xlu0 %v1770_v31  ;;  %v3567_v31 = vld [vmem:[%s5386_s26 + $0x28] sm:$0xff] }
 0x815   : > { %v4136_v30 = vpack.c.bf16 %v3567_v31, %v3566_v42 }
 0x817   : > { %4137 = vmatprep.subr.bf16.mxu1 %v4136_v30 }
 0x89d   : > { %v1769_v58 = vpop.xlane.xlu0 %1768 }
 0x89e   : > { %v1773_v59 = vmul.f32 0.03125, %v1769_v58  ;;  %v3565_v58 = vld [vmem:[%s5332_s14] ss:$0 sm:$0xff] }
 0x8a0   : > { %v1775_v60 = vadd.f32 1e-05, %v1773_v59 }
 0x8a1   : > { %v1772_v61 = vpop.xlane.xlu0 %1771 }
 0x8a2   : > { %4397 = vrsqrt.f32 %v1775_v60  ;;  %v1774_v62 = vmul.f32 0.03125, %v1772_v61 }
 0x8a4   : > { %v1776_v63 = vadd.f32 1e-05, %v1774_v62 }
 0x8a6   : > { %4399 = vrsqrt.f32 %v1776_v63  ;;  %v3571_v63 = vld [vmem:[%s5322_s4 + $0x1] ss:$0 sm:$0xff] }
 0x8ac   : > { %v4398_v0 = vpop.eup %4397 }
 0x8ad   : > { %v1779_v3 = vmul.f32 %v4398_v0, %v1763_v38 }
 0x8af   : > { %v1787_v5 = vmul.f32 %v3556_v2, %v1779_v3 }
 0x8b0   : > { %v4400_v6 = vpop.eup %4399 }
 0x8b1   : > { %v1780_v7 = vmul.f32 %v4400_v6, %v1764_v36  ;;  %v1795_v8 = vadd.f32 %v3557_v4, %v1787_v5 }
 0x8b3   : > { %v1788_v9 = vmul.f32 %v3556_v2, %v1780_v7  ;;  %3891 = vmatprep.mubr.msk.f32.mxu1 %vm727_vm1, %v1795_v8 }
 0x8b5   : > { %v1796_v10 = vadd.f32 %v3557_v4, %v1788_v9 }
 0x8b7   : > { %3892 = vmatmul.mubr.msk.f32.vlgmr.msra.gmra.mrb[14].mxu1 %vm727_vm1, %v1796_v10 }
 0x8b8   : > { %4139 = vmatpush3.bf16.msra.mxu1 %v4136_v30 }
 0x8b9   : > { %4141 = vmatprep.subr.bf16.mxu1 %v4140_v45 }
 0x8bc   : > { %4143 = vmatpush3.bf16.msra.mxu1 %v4140_v45 }
 0x98a   : > { %v3893_v15 = vpop.f32.mrb[14].mxu1 }
 0x98b   : > { %v1886_v16 = vadd.f32 %v3893_v15, %v3558_v14  ;;  %v1880_v17 = vpop.f32.mrb[15].mxu1 }
 0x98c   : > { %v1881_v18 = vadd.f32 %v3558_v14, %v1880_v17 }
 0x98d   : > { %v1890_v20 = vmax.f32 %v1886_v16, 0.0 }
 0x98e   : > { %v1889_v19 = vmax.f32 %v1881_v18, 0.0 }
 0x990   : > { %3910 = vmatprep.mubr.msk.f32.mxu0 %vm1906_vm7, %v1889_v19 }
 0x991   : > { %3911 = vmatmul.mubr.msk.f32.vlgmr.msra.gmra.mrb[8].mxu0 %vm1906_vm7, %v1890_v20 }
 0xa64   : > { %v3912_v22 = vpop.f32.mrb[8].mxu0 }
 0xa65   : > { %v1985_v23 = vadd.f32 %v3912_v22, %v3561_v21  ;;  %v1979_v24 = vpop.f32.mrb[9].mxu0 }
 0xa66   : > { %v1980_v25 = vadd.f32 %v3561_v21, %v1979_v24 }
 0xa67   : > { %v1989_v41 = vadd.f32 %v1985_v23, %v1796_v10 }
 0xa68   : > { %v1988_v43 = vadd.f32 %v1980_v25, %v1795_v8 }
 0xa69   : > { %v1995_v26 = vsel %vm727_vm1, %v1989_v41, 0.0 }
 0xa6a   : > { %1996 = vadd.xlane.f32.xlu0 %v1995_v26  ;;  %v1992_v27 = vsel %vm727_vm1, %v1988_v43, 0.0 }
 0xa6b   : > { %1993 = vadd.xlane.f32.xlu1 %v1992_v27 }
 0xaf7   : > { %v1997_v28 = vpop.xlane.xlu0 %1996 }
 0xaf8   : > { %v1999_v29 = vmul.f32 0.03125, %v1997_v28  ;;  %v1994_v32 = vpop.xlane.xlu1 %1993 }
 0xaf9   : > { %v1998_v33 = vmul.f32 0.03125, %v1994_v32 }
 0xafa   : > { %v2001_v34 = vsub.f32 %v1989_v41, %v1999_v29 }
 0xafb   : > { %v2000_v35 = vsub.f32 %v1988_v43, %v1998_v33 }
 0xafc   : > { %v2003_v36 = vmul.f32 %v2001_v34, %v2001_v34 }
 0xafd   : > { %v2002_v38 = vmul.f32 %v2000_v35, %v2000_v35 }
 0xafe   : > { %v2007_v39 = vsel %vm727_vm1, %v2003_v36, 0.0 }
 0xaff   : > { %2008 = vadd.xlane.f32.xlu0 %v2007_v39  ;;  %v2004_v40 = vsel %vm727_vm1, %v2002_v38, 0.0 }
 0xb00   : > { %2005 = vadd.xlane.f32.xlu1 %v2004_v40 }
 0xb8c   : > { %v2009_v47 = vpop.xlane.xlu0 %2008 }
 0xb8d   : > { %v2011_v48 = vmul.f32 0.03125, %v2009_v47  ;;  %v2006_v49 = vpop.xlane.xlu1 %2005 }
 0xb8e   : > { %v2010_v51 = vmul.f32 0.03125, %v2006_v49 }
 0xb8f   : > { %v2013_v52 = vadd.f32 1e-05, %v2011_v48 }
 0xb90   : > { %v2012_v53 = vadd.f32 1e-05, %v2010_v51 }
 0xb91   : > { %4401 = vrsqrt.f32 %v2013_v52 }
 0xb92   : > { %4403 = vrsqrt.f32 %v2012_v53 }
 0xb9b   : > { %v4402_v37 = vpop.eup %4401 }
 0xb9c   : > { %v4404_v55 = vpop.eup %4403  ;;  %v2017_v56 = vmul.f32 %v4402_v37, %v2001_v34 }
 0xb9d   : > { %v2016_v57 = vmul.f32 %v4404_v55, %v2000_v35 }
 0xb9e   : > { %v2025_v59 = vmul.f32 %v3564_v54, %v2017_v56 }
 0xb9f   : > { %v2024_v60 = vmul.f32 %v3564_v54, %v2016_v57 }
 0xba0   : > { %v5035_v62 = vadd.f32 %v3565_v58, %v2025_v59 }
 0xba1   : > { %v5033_v61 = vadd.f32 %v3565_v58, %v2024_v60 }
 0xba3   : > { %3921 = vmatprep.mubr.msk.f32.mxu1 %vm727_vm1, %v5033_v61 }
 0xba4   : > { %3922 = vmatmul.mubr.msk.f32.vlgmr.msra.gmra.mrb[16].mxu1 %vm727_vm1, %v5035_v62 }
 0xc77   : > { %v3923_v0 = vpop.f32.mrb[16].mxu1 }
 0xc78   : > { %v2125_v2 = vadd.f32 %v3923_v0, %v3571_v63  ;;  %v2119_v3 = vpop.f32.mrb[17].mxu1 }
 0xc79   : > { %v2120_v4 = vadd.f32 %v3571_v63, %v2119_v3 }
 0xc7a   : > { %2136 = vrot.lane.b32.xlu1 %v2125_v2, %s4544_s29  ;;  %2132 = vrot.lane.b32.xlu0 %v2125_v2, %s4545_s27 }
 0xc7b   : > { %3928 = vmatprep.mubr.msk.f32.mxu1 %vm827_vm2, %v2120_v4  ;;  %v5049_v5 = vpack.i.bf16 %v2125_v2, %v2120_v4 }
 0xc7e   : > { %2138 = vrot.lane.b32.xlu0 %v2120_v4, %s5389_s20  ;;  %2130 = vrot.lane.b32.xlu1 %v2120_v4, %s4545_s27  ;;  %s3437_s27 = scalar_lea.sflag [#allocation4], %s608_s22 }
 0xc82   : > { %4326 = vrot.lane.b32.xlu0 %v5049_v5, %s5390_s24  ;;  %2134 = vrot.lane.b32.xlu1 %v2120_v4, %s4544_s29  ;;  %s5391_s29 = smov 64  }
 0xc86   : > { %2140 = vrot.lane.b32.xlu1 %v2125_v2, %s5389_s20  ;;  %s5393_s20 = smov 16  }
 0xcec   : > { %v2137_v6 = vpop.permute.xlu1 %2136  ;;  %v2133_v7 = vpop.permute.xlu0 %2132 }
 0xcf0   : > { %v2139_v8 = vpop.permute.xlu0 %2138  ;;  %v2131_v9 = vpop.permute.xlu1 %2130 }
 0xcf1   : > { %v5055_v10 = vpack.i.bf16 %v2133_v7, %v2131_v9  ;;  %3935 = vmatprep.mubr.msk.f32.mxu0 %vm827_vm2, %v2131_v9 }
 0xcf3   : > { %4331 = vrot.lane.b32.xlu1 %v5055_v10, %s5390_s24 }
 0xcf4   : > { %v4327_v11 = vpop.permute.xlu0 %4326  ;;  %v2135_v12 = vpop.permute.xlu1 %2134 }
 0xcf5   : > { %v4329_v13 = vunpack.i.h.bf16 %v4327_v11  ;;  %v4328_v14 = vunpack.i.l.bf16 %v4327_v11  ;;  %v5060_v15 = vpack.i.bf16 %v2137_v6, %v2135_v12 }
 0xcf7   : > { %v4144_v16 = vpack.c.bf16 %v4329_v13, %v4328_v14  ;;  %4336 = vrot.lane.b32.xlu0 %v5060_v15, %s5390_s24 }
 0xcf8   : > { %v2141_v17 = vpop.permute.xlu1 %2140 }
 0xcf9   : > { %v5064_v18 = vpack.i.bf16 %v2141_v17, %v2139_v8  ;;  %4146 = vmatprep.subr.msk.bf16.mxu1 %vm4835_vm3, %v4144_v16 }
 0xcfa   : > { %4149 = vmatpush3.bf16.xpose.msk.msra.mxu1 %vm4835_vm3, %v4144_v16 }
 0xcfb   : > { %4341 = vrot.lane.b32.xlu1 %v5064_v18, %s5390_s24  ;;  %s5394_s24 = smov 24  }
 0xd01   : > { %3929 = vmatmul.mubr.msk.f32.vlgmr.msra.gmra.mrb[18].mxu1 %vm827_vm2, %v2125_v2 }
 0xd02   : > { %3942 = vmatprep.mubr.msk.f32.mxu1 %vm827_vm2, %v2135_v12 }
 0xd65   : > { %v4332_v19 = vpop.permute.xlu1 %4331 }
 0xd66   : > { %v4334_v20 = vunpack.i.h.bf16 %v4332_v19  ;;  %v4333_v21 = vunpack.i.l.bf16 %v4332_v19 }
 0xd68   : > { %v4150_v22 = vpack.c.bf16 %v4334_v20, %v4333_v21 }
 0xd69   : > { %v4337_v23 = vpop.permute.xlu0 %4336 }
 0xd6a   : > { %v4339_v24 = vunpack.i.h.bf16 %v4337_v23  ;;  %v4338_v25 = vunpack.i.l.bf16 %v4337_v23  ;;  %4152 = vmatprep.subr.msk.bf16.mxu0 %vm4835_vm3, %v4150_v22 }
 0xd6b   : > { %4155 = vmatpush3.bf16.xpose.msk.msra.mxu0 %vm4835_vm3, %v4150_v22 }
 0xd6c   : > { %v4156_v41 = vpack.c.bf16 %v4339_v24, %v4338_v25 }
 0xd6d   : > { %v4342_v43 = vpop.permute.xlu1 %4341 }
 0xd6e   : > { %v4344_v26 = vunpack.i.h.bf16 %v4342_v43  ;;  %v4343_v27 = vunpack.i.l.bf16 %v4342_v43  ;;  %4158 = vmatprep.subr.msk.bf16.mxu1 %vm4835_vm3, %v4156_v41 }
 0xd6f   : > { %4161 = vmatpush3.bf16.xpose.msk.msra.mxu1 %vm4835_vm3, %v4156_v41 }
 0xd70   : > { %v4162_v28 = vpack.c.bf16 %v4344_v26, %v4343_v27 }
 0xd72   : > { %3936 = vmatmul.mubr.msk.f32.vlgmr.msra.gmra.mrb[10].mxu0 %vm827_vm2, %v2133_v7  ;;  %4164 = vmatprep.subr.msk.bf16.mxu0 %vm4835_vm3, %v4162_v28 }
 0xd73   : > { %4167 = vmatpush3.bf16.xpose.msk.msra.mxu0 %vm4835_vm3, %v4162_v28  ;;  %3949 = vmatprep.mubr.msk.f32.mxu0 %vm827_vm2, %v2139_v8 }
 0xd76   : > { %3943 = vmatmul.mubr.msk.f32.vlgmr.msra.gmra.mrb[20].mxu1 %vm827_vm2, %v2137_v6 }
 0xd7a   : > { %3950 = vmatmul.mubr.msk.f32.vlgmr.msra.gmra.mrb[12].mxu0 %vm827_vm2, %v2141_v17 }
 0xdd4   : > { %v3930_v29 = vpop.f32.mrb[18].mxu1 }
 0xdd5   : > { %v2491_v32 = vmul.f32 0.35355338, %v3930_v29  ;;  %v2220_v33 = vpop.f32.mrb[19].mxu1 }
 0xdd6   : > { %v2490_v34 = vmul.f32 0.35355338, %v2220_v33 }
 0xdd7   : > { %v2499_v35 = vsel %vm715_vm4, %v2491_v32, -1e+30 }
 0xdd8   : > { %v2509_v36 = vsel %vm1190_vm5, %v2499_v35, -inf  ;;  %v2498_v38 = vsel %vm715_vm4, %v2490_v34, -1e+30 }
 0xdd9   : > { %2510 = vmax.xlane.f32.xlu1 %v2509_v36  ;;  %v2506_v50 = vsel %vm1190_vm5, %v2498_v38, -inf }
 0xdda   : > { %2507 = vmax.xlane.f32.xlu0 %v2506_v50 }
 0xe45   : > { %v3937_v39 = vpop.f32.mrb[10].mxu0 }
 0xe46   : > { %v2493_v40 = vmul.f32 0.35355338, %v3937_v39  ;;  %v2307_v42 = vpop.f32.mrb[11].mxu0 }
 0xe47   : > { %v2492_v31 = vmul.f32 0.35355338, %v2307_v42 }
 0xe48   : > { %v2501_v30 = vsel %vm715_vm4, %v2493_v40, -1e+30 }
 0xe49   : > { %v3944_v46 = vpop.f32.mrb[20].mxu1  ;;  %v2515_v44 = vsel %vm1190_vm5, %v2501_v30, -inf  ;;  %v2500_v48 = vsel %vm715_vm4, %v2492_v31, -1e+30 }
 0xe4a   : > { %v2495_v45 = vmul.f32 0.35355338, %v3944_v46  ;;  %2516 = vmax.xlane.f32.xlu0 %v2515_v44  ;;  %v2394_v47 = vpop.f32.mrb[21].mxu1  ;;  %v2512_v52 = vsel %vm1190_vm5, %v2500_v48, -inf }
 0xe4b   : > { %v2494_v49 = vmul.f32 0.35355338, %v2394_v47 }
 0xe4c   : > { %v2503_v56 = vsel %vm715_vm4, %v2495_v45, -1e+30 }
 0xe4d   : > { %v3951_v51 = vpop.f32.mrb[12].mxu0  ;;  %v2502_v53 = vsel %vm715_vm4, %v2494_v49, -1e+30  ;;  %v2521_v58 = vsel %vm1190_vm5, %v2503_v56, -inf }
 0xe4e   : > { %v2497_v37 = vmul.f32 0.35355338, %v3951_v51  ;;  %v2481_v54 = vpop.f32.mrb[13].mxu0  ;;  %2513 = vmax.xlane.f32.xlu0 %v2512_v52  ;;  %v2518_v55 = vsel %vm1190_vm5, %v2502_v53, -inf }
 0xe4f   : > { %v2496_v57 = vmul.f32 0.35355338, %v2481_v54  ;;  %2519 = vmax.xlane.f32.xlu1 %v2518_v55 }
 0xe50   : > { %v2505_v63 = vsel %vm715_vm4, %v2497_v37, -1e+30 }
 0xe51   : > { %v5110_v59 = vsel %vm715_vm4, %v2496_v57, -1e+30  ;;  %v2527_v0 = vsel %vm1190_vm5, %v2505_v63, -inf }
 0xe52   : > { %2522 = vmax.xlane.f32.xlu0 %v2521_v58  ;;  %v2524_v60 = vsel %vm1190_vm5, %v5110_v59, -inf }
 0xe53   : > { %2525 = vmax.xlane.f32.xlu1 %v2524_v60 }
 0xe56   : > { %2528 = vmax.xlane.f32.xlu0 %v2527_v0 }
 0xe64   : > { %4346 = vrot.lane.b32.xlu1 %v5049_v5, %s5391_s29 }
 0xe66   : > { %v2511_v2 = vpop.xlane.xlu1 %2510 }
 0xe67   : > { %v2531_v3 = vsub.f32 %v2499_v35, %v2511_v2  ;;  %v2508_v6 = vpop.xlane.xlu0 %2507 }
 0xe68   : > { %v2530_v7 = vsub.f32 %v2498_v38, %v2508_v6 }
 0xe69   : > { %v2540_v4 = vmul.f32 1.442695, %v2531_v3 }
 0xe6a   : > { %v2538_v9 = vmul.f32 1.442695, %v2530_v7 }
 0xe6b   : > { %4405 = vpow2.f32 %v2540_v4 }
 0xe6c   : > { %4407 = vpow2.f32 %v2538_v9 }
 0xe75   : > { %v5119_v8 = vpop.eup %4405 }
 0xe76   : > { %v2557_v1 = vsel %vm1190_vm5, %v5119_v8, 0.0  ;;  %v4408_v11 = vpop.eup %4407 }
 0xe77   : > { %2558 = vadd.xlane.f32.xlu0 %v2557_v1  ;;  %v2554_v12 = vsel %vm1190_vm5, %v4408_v11, 0.0 }
 0xe88   : > { %2555 = vadd.xlane.f32.xlu1 %v2554_v12 }
 0xed7   : > { %v2517_v13 = vpop.xlane.xlu0 %2516 }
 0xed8   : > { %v2533_v5 = vsub.f32 %v2501_v30, %v2517_v13 }
 0xeda   : > { %v2544_v14 = vmul.f32 1.442695, %v2533_v5 }
 0xedb   : > { %v2514_v16 = vpop.xlane.xlu0 %2513 }
 0xedc   : > { %4409 = vpow2.f32 %v2544_v14  ;;  %v2532_v17 = vsub.f32 %v2500_v48, %v2514_v16  ;;  %v2520_v19 = vpop.xlane.xlu1 %2519 }
 0xedd   : > { %v2534_v20 = vsub.f32 %v2502_v53, %v2520_v19 }
 0xede   : > { %v2542_v21 = vmul.f32 1.442695, %v2532_v17 }
 0xedf   : > { %v2546_v22 = vmul.f32 1.442695, %v2534_v20  ;;  %v2523_v23 = vpop.xlane.xlu0 %2522 }
 0xee0   : > { %4411 = vpow2.f32 %v2542_v21  ;;  %v2535_v24 = vsub.f32 %v2503_v56, %v2523_v23  ;;  %v2526_v25 = vpop.xlane.xlu1 %2525 }
 0xee1   : > { %4413 = vpow2.f32 %v2546_v22  ;;  %v2536_v46 = vsub.f32 %v5110_v59, %v2526_v25  ;;  %v3599_v25 = vld [vmem:[%s5323_s5 + $0x28] sm:$0xff] }
 0xee2   : > { %v2548_v41 = vmul.f32 1.442695, %v2535_v24  ;;  %v3598_v24 = vld [vmem:[%s5323_s5 + $0x20] sm:$0xff] }
 0xee3   : > { %v2529_v43 = vpop.xlane.xlu0 %2528  ;;  %v2550_v45 = vmul.f32 1.442695, %v2536_v46 }
 0xee4   : > { %4415 = vpow2.f32 %v2548_v41  ;;  %v2537_v26 = vsub.f32 %v2505_v63, %v2529_v43  ;;  %v4347_v27 = vpop.permute.xlu1 %4346  ;;  %v3600_v41 = vld [vmem:[%s5323_s5 + $0x30] sm:$0xff]  ;;  %v4184_v43 = vpack.c.bf16 %v3599_v25, %v3598_v24  ;;  %v3608_v25 = vld [vmem:[%s5329_s11 + $0x1] ss:$0 sm:$0xff] }
 0xee5   : > { %v4349_v28 = vunpack.i.h.bf16 %v4347_v27  ;;  %v4348_v29 = vunpack.i.l.bf16 %v4347_v27 }
 0xee6   : > { %v5124_v32 = vpop.eup %4409  ;;  %v2552_v33 = vmul.f32 1.442695, %v2537_v26  ;;  %v3601_v26 = vld [vmem:[%s5323_s5 + $0x38] sm:$0xff] }
 0xee7   : > { %v4168_v34 = vpack.c.bf16 %v4349_v28, %v4348_v29  ;;  %v2563_v35 = vsel %vm1190_vm5, %v5124_v32, 0.0  ;;  %v4188_v27 = vpack.c.bf16 %v3601_v26, %v3600_v41 }
 0xee8   : > { %4417 = vpow2.f32 %v2552_v33  ;;  %2564 = vadd.xlane.f32.xlu0 %v2563_v35 }
 0xee9   : > { %4169 = vmatprep.subr.bf16.mxu1 %v4168_v34 }
 0xeea   : > { %v4412_v36 = vpop.eup %4411  ;;  %4171 = vmatpush3.bf16.msra.mxu1 %v4168_v34 }
 0xeeb   : > { %v2560_v38 = vsel %vm1190_vm5, %v4412_v36, 0.0  ;;  %v4414_v50 = vpop.eup %4413 }
 0xeec   : > { %2561 = vadd.xlane.f32.xlu1 %v2560_v38  ;;  %v2566_v42 = vsel %vm1190_vm5, %v4414_v50, 0.0 }
 0xeee   : > { %v4416_v39 = vpop.eup %4415 }
 0xeef   : > { %v2569_v40 = vsel %vm1190_vm5, %v4416_v39, 0.0 }
 0xef0   : > { %2570 = vadd.xlane.f32.xlu0 %v2569_v40  ;;  %2567 = vadd.xlane.f32.xlu1 %v2566_v42 }
 0xef2   : > { %v5131_v31 = vpop.eup %4417 }
 0xef3   : > { %v2575_v30 = vsel %vm1190_vm5, %v5131_v31, 0.0 }
 0xef4   : > { %2576 = vadd.xlane.f32.xlu0 %v2575_v30 }
 0xf01   : > { %4356 = vrot.lane.b32.xlu1 %v5060_v15, %s5391_s29 }
 0xf04   : > { %v2559_v44 = vpop.xlane.xlu0 %2558 }
 0xf05   : > { %4419 = vrcp.f32 %v2559_v44 }
 0xf0a   : > { %4351 = vrot.lane.b32.xlu0 %v5055_v10, %s5391_s29 }
 0xf0f   : > { %v4420_v48 = vpop.eup %4419 }
 0xf10   : > { %v2587_v53 = vmul.f32 %v4420_v48, %v5119_v8  ;;  %v3603_v48 = vld [vmem:[%s5324_s6 + $0x1] ss:$0 sm:$0xff] }
 0xf15   : > { %v2556_v47 = vpop.xlane.xlu1 %2555 }
 0xf16   : > { %4421 = vrcp.f32 %v2556_v47 }
 0xf17   : > { %4423 = vpow2.f32 %v2550_v45 }
 0xf20   : > { %v4422_v49 = vpop.eup %4421 }
 0xf21   : > { %v4424_v51 = vpop.eup %4423  ;;  %v2586_v52 = vmul.f32 %v4422_v49, %v4408_v11 }
 0xf22   : > { %v2572_v10 = vsel %vm1190_vm5, %v4424_v51, 0.0 }
 0xf23   : > { %3956 = vmatprep.mubr.msk.f32.mxu1 %vm1190_vm5, %v2586_v52 }
 0xf24   : > { %3957 = vmatmul.mubr.msk.f32.vlgmr.msra.gmra.mrb[22].mxu1 %vm1190_vm5, %v2587_v53 }
 0xf25   : > { %2573 = vadd.xlane.f32.xlu1 %v2572_v10 }
 0xf36   : > { %4361 = vrot.lane.b32.xlu1 %v5064_v18, %s5391_s29 }
 0xf75   : > { %v2565_v15 = vpop.xlane.xlu0 %2564 }
 0xf79   : > { %v2562_v37 = vpop.xlane.xlu1 %2561 }
 0xf7a   : > { %4425 = vrcp.f32 %v2562_v37 }
 0xf7b   : > { %4427 = vrcp.f32 %v2565_v15 }
 0xf7d   : > { %v2571_v54 = vpop.xlane.xlu0 %2570  ;;  %v2568_v55 = vpop.xlane.xlu1 %2567 }
 0xf7e   : > { %4429 = vrcp.f32 %v2571_v54 }
 0xf7f   : > { %4431 = vrcp.f32 %v2568_v55 }
 0xf81   : > { %v2577_v56 = vpop.xlane.xlu0 %2576  ;;  %v4357_v57 = vpop.permute.xlu1 %4356 }
 0xf82   : > { %v4359_v58 = vunpack.i.h.bf16 %v4357_v57  ;;  %v4358_v59 = vunpack.i.l.bf16 %v4357_v57  ;;  %4433 = vrcp.f32 %v2577_v56 }
 0xf84   : > { %v4426_v60 = vpop.eup %4425  ;;  %v4176_v63 = vpack.c.bf16 %v4359_v58, %v4358_v59 }
 0xf85   : > { %v4352_v0 = vpop.permute.xlu0 %4351  ;;  %v2588_v2 = vmul.f32 %v4426_v60, %v4412_v36  ;;  %v4428_v18 = vpop.eup %4427 }
 0xf86   : > { %v4354_v3 = vunpack.i.h.bf16 %v4352_v0  ;;  %v4353_v4 = vunpack.i.l.bf16 %v4352_v0  ;;  %4177 = vmatprep.subr.bf16.mxu0 %v4176_v63  ;;  %v2589_v11 = vmul.f32 %v4428_v18, %v5124_v32  ;;  %v3612_v18 = vld [vmem:[%s5325_s7 + $0x30] sm:$0xff] }
 0xf87   : > { %3963 = vmatprep.mubr.msk.f32.mxu1 %vm1190_vm5, %v2588_v2  ;;  %4179 = vmatpush3.bf16.msra.mxu0 %v4176_v63 }
 0xf88   : > { %v4430_v6 = vpop.eup %4429  ;;  %v4172_v7 = vpack.c.bf16 %v4354_v3, %v4353_v4  ;;  %4185 = vmatprep.subr.bf16.mxu0 %v4184_v43  ;;  %v3611_v3 = vld [vmem:[%s5325_s7 + $0x28] sm:$0xff] }
 0xf89   : > { %v4432_v8 = vpop.eup %4431  ;;  %v2591_v9 = vmul.f32 %v4430_v6, %v4416_v39  ;;  %v3613_v6 = vld [vmem:[%s5325_s7 + $0x38] sm:$0xff] }
 0xf8a   : > { %4173 = vmatprep.subr.bf16.mxu1 %v4172_v7  ;;  %v2590_v1 = vmul.f32 %v4432_v8, %v4414_v50  ;;  %v3618_v8 = vld [vmem:[%s5327_s9 + $0x40] sm:$0xff] }
 0xf8b   : > { %4175 = vmatpush3.bf16.msra.mxu1 %v4172_v7  ;;  %v4196_v7 = vpack.c.bf16 %v3613_v6, %v3612_v18  ;;  %v3357_v18 = vld [vmem:[%s5335_s17] sm:$0xff]  ;;  %v3358_v6 = vld [vmem:[%s5335_s17 + $0x8] sm:$0xff] }
 0xf8c   : > { %3970 = vmatprep.mubr.msk.f32.mxu0 %vm1190_vm5, %v2590_v1  ;;  %v4434_v17 = vpop.eup %4433  ;;  %v3620_v1 = vld [vmem:[%s5327_s9 + $0x50] sm:$0xff] }
 0xf8d   : > { %3971 = vmatmul.mubr.msk.f32.vlgmr.msra.gmra.mrb[14].mxu0 %vm1190_vm5, %v2591_v9  ;;  %v2593_v21 = vmul.f32 %v4434_v17, %v5131_v31  ;;  %v3619_v9 = vld [vmem:[%s5327_s9 + $0x48] sm:$0xff] }
 0xf8e   : > { %3964 = vmatmul.mubr.msk.f32.vlgmr.msra.gmra.mrb[24].mxu1 %vm1190_vm5, %v2589_v11  ;;  %4187 = vmatpush3.bf16.msra.mxu0 %v4184_v43  ;;  %v4200_v11 = vpack.c.bf16 %v3619_v9, %v3618_v8  ;;  %v3609_v43 = vld [vmem:[%s5330_s12 + $0x1] ss:$0 sm:$0xff]  ;;  %v4552_v8 = vmov 0.0|0.0   ;;  %v3359_v9 = vld [vmem:[%s5335_s17 + $0x10] sm:$0xff] }
 0xf8f   : > { %4189 = vmatprep.subr.bf16.mxu0 %v4188_v27 }
 0xf92   : > { %4191 = vmatpush3.bf16.msra.mxu0 %v4188_v27 }
 0xf93   : > { %4201 = vmatprep.subr.bf16.mxu0 %v4200_v11 }
 0xfb2   : > { %v2574_v12 = vpop.xlane.xlu1 %2573 }
 0xfb3   : > { %4435 = vrcp.f32 %v2574_v12  ;;  %v3621_v12 = vld [vmem:[%s5327_s9 + $0x58] sm:$0xff] }
 0xfb6   : > { %v4362_v13 = vpop.permute.xlu1 %4361 }
 0xfb7   : > { %v4364_v5 = vunpack.i.h.bf16 %v4362_v13  ;;  %v4363_v14 = vunpack.i.l.bf16 %v4362_v13  ;;  %v4204_v13 = vpack.c.bf16 %v3621_v12, %v3620_v1  ;;  %v3360_v1 = vld [vmem:[%s5335_s17 + $0x18] sm:$0xff]  ;;  %v4554_v12 = vmov 0.0  }
 0xfb9   : > { %v4180_v16 = vpack.c.bf16 %v4364_v5, %v4363_v14  ;;  %v3622_v5 = vld [vmem:[%s5327_s9 + $0x60] sm:$0xff]  ;;  %v3623_v14 = vld [vmem:[%s5327_s9 + $0x68] sm:$0xff] }
 0xfbb   : > { %4181 = vmatprep.subr.bf16.mxu1 %v4180_v16 }
 0xfbc   : > { %4183 = vmatpush3.bf16.msra.mxu1 %v4180_v16  ;;  %v4208_v16 = vpack.c.bf16 %v3623_v14, %v3622_v5 }
 0xfbd   : > { %v4436_v19 = vpop.eup %4435 }
 0xfbe   : > { %v2592_v20 = vmul.f32 %v4436_v19, %v4424_v51 }
 0xfc0   : > { %3977 = vmatprep.mubr.msk.f32.mxu1 %vm1190_vm5, %v2592_v20 }
 0xfc1   : > { %3978 = vmatmul.mubr.msk.f32.vlgmr.msra.gmra.mrb[26].mxu1 %vm1190_vm5, %v2593_v21 }
 0xff7   : > { %v3958_v22 = vpop.f32.mrb[22].mxu1 }
 0xff8   : > { %v2672_v23 = vpop.f32.mrb[23].mxu1 }
0x1060   : > { %v3972_v28 = vpop.f32.mrb[14].mxu0 }
0x1061   : > { %v2846_v29 = vpop.f32.mrb[15].mxu0  ;;  %v3965_v32 = vpop.f32.mrb[24].mxu1 }
0x1062   : > { %2946 = vrot.lane.b32.xlu1 %v3965_v32, %s5392_s21  ;;  %v2759_v33 = vpop.f32.mrb[25].mxu1 }
0x1063   : > { %2944 = vrot.lane.b32.xlu0 %v2759_v33, %s5392_s21 }
0x1066   : > { %2954 = vrot.lane.b32.xlu1 %v3972_v28, %s5393_s20 }
0x1067   : > { %2952 = vrot.lane.b32.xlu0 %v2846_v29, %s5393_s20 }
0x1094   : > { %v3979_v34 = vpop.f32.mrb[26].mxu1 }
0x1095   : > { %2962 = vrot.lane.b32.xlu1 %v3979_v34, %s5394_s24  ;;  %v2933_v35 = vpop.f32.mrb[27].mxu1  ;;  %v3624_v34 = vld [vmem:[%s5327_s9 + $0x70] sm:$0xff] }
0x1096   : > { %2960 = vrot.lane.b32.xlu0 %v2933_v35, %s5394_s24  ;;  %v3625_v35 = vld [vmem:[%s5327_s9 + $0x78] sm:$0xff]  ;;  %s5396_s24 = sld [smem:[#allocation19_spill]] }
0x109c   : > { %s5276_s29 = scalar_lea.hbm %s5396_s24, %s3635_s23 }
0x10d4   : > { %v2947_v36 = vpop.permute.xlu1 %2946 }
0x10d5   : > { %v2945_v38 = vpop.permute.xlu0 %2944  ;;  %v2967_v31 = vsel %vm827_vm2, %v3958_v22, %v2947_v36  ;;  %v4212_v36 = vpack.c.bf16 %v3625_v35, %v3624_v34 }
0x10d6   : > { %v2966_v40 = vsel %vm827_vm2, %v2672_v23, %v2945_v38  ;;  %v3615_v38 = vld [vmem:[%s5326_s8 + $0x1] ss:$0 sm:$0xff] }
0x10d8   : > { %v2955_v50 = vpop.permute.xlu1 %2954 }
0x10d9   : > { %v2953_v39 = vpop.permute.xlu0 %2952  ;;  %v2969_v44 = vsel %vm1190_vm5, %v2967_v31, %v2955_v50 }
0x10da   : > { %v2968_v30 = vsel %vm1190_vm5, %v2966_v40, %v2953_v39 }
0x1107   : > { %v2963_v42 = vpop.permute.xlu1 %2962 }
0x1108   : > { %v2961_v46 = vpop.permute.xlu0 %2960  ;;  %v2971_v47 = vsel %vm1655_vm6, %v2969_v44, %v2963_v42 }
0x1109   : > { %v2970_v45 = vsel %vm1655_vm6, %v2968_v30, %v2961_v46  ;;  %v3627_v46 = vld [vmem:[%s5328_s10 + $0x1] ss:$0 sm:$0xff] }
0x110a   : > { %3988 = vmatprep.mubr.msk.f32.mxu0 %vm727_vm1, %v2970_v45 }
0x110b   : > { %3989 = vmatmul.mubr.msk.f32.vlgmr.msra.gmra.mrb[16].mxu0 %vm727_vm1, %v2971_v47 }
0x110c   : > { %4203 = vmatpush3.bf16.msra.mxu0 %v4200_v11  ;;  %v4220_v11 = vpack.c.bf16 %v3360_v1, %v3359_v9 }
0x110d   : > { %4205 = vmatprep.subr.bf16.mxu0 %v4204_v13 }
0x1110   : > { %4207 = vmatpush3.bf16.msra.mxu0 %v4204_v13 }
0x1111   : > { %4209 = vmatprep.subr.bf16.mxu0 %v4208_v16 }
0x1114   : > { %4211 = vmatpush3.bf16.msra.mxu0 %v4208_v16 }
0x1115   : > { %4213 = vmatprep.subr.bf16.mxu0 %v4212_v36 }
0x1118   : > { %4215 = vmatpush3.bf16.msra.mxu0 %v4212_v36 }
0x11de   : > { %v3990_v49 = vpop.f32.mrb[16].mxu0 }
0x11df   : > { %v3063_v51 = vadd.f32 %v3990_v49, %v3603_v48  ;;  %v3057_v52 = vpop.f32.mrb[17].mxu0 }
0x11e0   : > { %v3058_v53 = vadd.f32 %v3603_v48, %v3057_v52 }
0x11e1   : > { %v3067_v10 = vadd.f32 %v3063_v51, %v5035_v62 }
0x11e2   : > { %v3066_v15 = vadd.f32 %v3058_v53, %v5033_v61  ;;  %v3610_v61 = vld [vmem:[%s5325_s7 + $0x20] sm:$0xff] }
0x11e3   : > { %v3075_v37 = vsel %vm727_vm1, %v3067_v10, 0.0  ;;  %v4192_v4 = vpack.c.bf16 %v3611_v3, %v3610_v61 }
0x11e4   : > { %3076 = vadd.xlane.f32.xlu1 %v3075_v37  ;;  %v3072_v54 = vsel %vm727_vm1, %v3066_v15, 0.0 }
0x11e5   : > { %3073 = vadd.xlane.f32.xlu0 %v3072_v54  ;;  %4193 = vmatprep.subr.bf16.mxu1 %v4192_v4 }
0x11e6   : > { %4195 = vmatpush3.bf16.msra.mxu1 %v4192_v4 }
0x11e7   : > { %4197 = vmatprep.subr.bf16.mxu1 %v4196_v7 }
0x11ea   : > { %4199 = vmatpush3.bf16.msra.mxu1 %v4196_v7  ;;  %v4217_v7 = vpack.c.bf16 %v3358_v6, %v3357_v18 }
0x11eb   : > { %4216 = vmatprep.subr.bf16.mxu1 %v4552_v8 }
0x1271   : > { %v3077_v55 = vpop.xlane.xlu1 %3076 }
0x1272   : > { %v3079_v56 = vmul.f32 0.03125, %v3077_v55  ;;  %v3074_v57 = vpop.xlane.xlu0 %3073 }
0x1273   : > { %v3078_v58 = vmul.f32 0.03125, %v3074_v57  ;;  %v3632_v57 = vld [vmem:[%s5331_s13 + $0x1] ss:$0 sm:$0xff] }
0x1274   : > { %v3081_v59 = vsub.f32 %v3067_v10, %v3079_v56 }
0x1275   : > { %v3080_v60 = vsub.f32 %v3066_v15, %v3078_v58 }
0x1276   : > { %v3083_v2 = vmul.f32 %v3081_v59, %v3081_v59 }
0x1277   : > { %v3082_v63 = vmul.f32 %v3080_v60, %v3080_v60 }
0x1278   : > { %v3087_v62 = vsel %vm727_vm1, %v3083_v2, 0.0 }
0x1279   : > { %v3084_v0 = vsel %vm727_vm1, %v3082_v63, 0.0 }
0x127a   : > { %3085 = vadd.xlane.f32.xlu0 %v3084_v0 }
0x127e   : > { %3088 = vadd.xlane.f32.xlu0 %v3087_v62 }
0x1307   : > { %v3086_v17 = vpop.xlane.xlu0 %3085 }
0x1308   : > { %v3090_v19 = vmul.f32 0.03125, %v3086_v17  ;;  %v3339_v17 = vld [vmem:[%s5333_s15] sm:$0x1] }
0x130a   : > { %v3092_v20 = vadd.f32 1e-05, %v3090_v19 }
0x130b   : > { %v3089_v21 = vpop.xlane.xlu0 %3088 }
0x130c   : > { %4437 = vrsqrt.f32 %v3092_v20  ;;  %v3091_v22 = vmul.f32 0.03125, %v3089_v21  ;;  %v3340_v20 = vld [vmem:[%s5334_s16] sm:$0x1] }
0x130e   : > { %v3093_v23 = vadd.f32 1e-05, %v3091_v22 }
0x1310   : > { %4439 = vrsqrt.f32 %v3093_v23  ;;  %v3361_v23 = vld [vmem:[%s5395_s19] sm:$0x1]  ;;  %s4479_s19 = scalar_lea.vmem %s4478_s2, 32 }
0x1311   : > { %p4481_p3 = scmp.lt.s32.totalorder %s4479_s19, %s4473_s18 }
0x1313   : > { %p4482_p4 = por %p4481_p3, %p4480_p2 }
0x1315   : > { %p4483_p7 = pnand %p4482_p4, %p4476_p12 }
0x1316   : > { %v4438_v24 = vpop.eup %4437 }
0x1317   : > { %v3096_v41 = vmul.f32 %v4438_v24, %v3080_v60 }
0x1319   : > { %v3104_v26 = vmul.f32 %v3608_v25, %v3096_v41 }
0x131a   : > { %v4440_v27 = vpop.eup %4439 }
0x131b   : > { %v3097_v28 = vmul.f32 %v4440_v27, %v3081_v59  ;;  %v3112_v29 = vadd.f32 %v3609_v43, %v3104_v26  ;;  %v3633_v59 = vld [vmem:[%s5332_s14 + $0x1] ss:$0 sm:$0xff] }
0x131d   : > { %v3105_v32 = vmul.f32 %v3608_v25, %v3097_v28  ;;  %3999 = vmatprep.mubr.msk.f32.mxu1 %vm727_vm1, %v3112_v29 }
0x131f   : > { %v3113_v33 = vadd.f32 %v3609_v43, %v3105_v32 }
0x1321   : > { %4000 = vmatmul.mubr.msk.f32.vlgmr.msra.gmra.mrb[28].mxu1 %vm727_vm1, %v3113_v33 }
0x1322   : > { %4218 = vmatpush3.bf16.msra.mxu1 %v4217_v7  ;;  %4029 = vmatprep.mubr.msk.f32.mxu1 %vm4553_vm9, %v4554_v12 }
0x1323   : > { %4219 = vmatprep.subr.bf16.mxu1 %v4552_v8 }
0x1326   : > { %4221 = vmatpush3.bf16.msra.mxu1 %v4220_v11 }
0x13f4   : > { %v4001_v50 = vpop.f32.mrb[28].mxu1 }
0x13f5   : > { %v3205_v39 = vadd.f32 %v4001_v50, %v3615_v38  ;;  %v3199_v40 = vpop.f32.mrb[29].mxu1 }
0x13f6   : > { %v3200_v42 = vadd.f32 %v3615_v38, %v3199_v40 }
0x13f7   : > { %v3209_v30 = vmax.f32 %v3205_v39, 0.0 }
0x13f8   : > { %v3208_v31 = vmax.f32 %v3200_v42, 0.0 }
0x13fa   : > { %4018 = vmatprep.mubr.msk.f32.mxu0 %vm1906_vm7, %v3208_v31 }
0x13fb   : > { %4019 = vmatmul.mubr.msk.f32.vlgmr.msra.gmra.mrb[18].mxu0 %vm1906_vm7, %v3209_v30 }
0x14ce   : > { %v4020_v44 = vpop.f32.mrb[18].mxu0 }
0x14cf   : > { %v3299_v45 = vpop.f32.mrb[19].mxu0 }
0x14d0   : > { %v3300_v47 = vadd.f32 %v3627_v46, %v3299_v45 }
0x14d2   : > { %v3307_v48 = vadd.f32 %v3300_v47, %v3112_v29 }
0x14d4   : > { %v3312_v49 = vsel %vm727_vm1, %v3307_v48, 0.0 }
0x14d5   : > { %3313 = vadd.xlane.f32.xlu1 %v3312_v49 }
0x1562   : > { %v3314_v51 = vpop.xlane.xlu1 %3313 }
0x1563   : > { %v3315_v52 = vmul.f32 0.03125, %v3314_v51 }
0x1565   : > { %v3316_v53 = vsub.f32 %v3307_v48, %v3315_v52 }
0x1567   : > { %v3317_v10 = vmul.f32 %v3316_v53, %v3316_v53 }
0x1569   : > { %v3318_v15 = vsel %vm727_vm1, %v3317_v10, 0.0 }
0x156a   : > { %3319 = vadd.xlane.f32.xlu0 %v3318_v15 }
0x15f7   : > { %v3320_v37 = vpop.xlane.xlu0 %3319 }
0x15f8   : > { %v3321_v54 = vmul.f32 0.03125, %v3320_v37 }
0x15fa   : > { %v3322_v55 = vadd.f32 1e-05, %v3321_v54 }
0x15fc   : > { %4441 = vrsqrt.f32 %v3322_v55 }
0x1606   : > { %v4442_v56 = vpop.eup %4441 }
0x1607   : > { %v3324_v58 = vmul.f32 %v4442_v56, %v3316_v53 }
0x1609   : > { %v3331_v60 = vmul.f32 %v3632_v57, %v3324_v58 }
0x160b   : > { %v3338_v63 = vadd.f32 %v3633_v59, %v3331_v60 }
0x160d   : > { %v3342_v0 = vsel %vm3341_vm8, %v3338_v63, 0.0 }
0x160e   : > { %3343 = vadd.xlane.f32.xlu1 %v3342_v0 }
0x169b   : > { %v3344_v2 = vpop.xlane.xlu1 %3343 }
0x169c   : > { %v3345_v62 = vmul.f32 0.03125, %v3344_v2 }
0x169e   : > { %v3346_v61 = vsub.f32 %v3338_v63, %v3345_v62 }
0x16a0   : > { %v3347_v3 = vmul.f32 %v3346_v61, %v3346_v61 }
0x16a2   : > { %v3348_v4 = vsel %vm3341_vm8, %v3347_v3, 0.0 }
0x16a3   : > { %3349 = vadd.xlane.f32.xlu0 %v3348_v4 }
0x1730   : > { %v3350_v13 = vpop.xlane.xlu0 %3349 }
0x1731   : > { %v3351_v5 = vmul.f32 0.03125, %v3350_v13 }
0x1733   : > { %v3352_v14 = vadd.f32 1e-05, %v3351_v5 }
0x1735   : > { %4443 = vrsqrt.f32 %v3352_v14 }
0x173f   : > { %v4444_v16 = vpop.eup %4443 }
0x1740   : > { %v3354_v19 = vmul.f32 %v4444_v16, %v3346_v61 }
0x1742   : > { %v3355_v21 = vmul.f32 %v3354_v19, %v3339_v17 }
0x1744   : > { %v3356_v22 = vadd.f32 %v3355_v21, %v3340_v20 }
0x1746   : > { %4030 = vmatmul.mubr.msk.f32.vlgmr.msra.gmra.mrb[30].mxu1 %vm727_vm1, %v3356_v22 }
0x1819   : > { %v3431_v24 = vpop.f32.mrb[30].mxu1 }
0x181a   : > { %v3432_v25 = vadd.f32 %v3431_v24, %v3361_v23  ;;  %v4031_v41 = vpop.f32.mrb[31].mxu1 }
0x181c   : > { %3435 = vst [vmem:[%s609_s0] sm:$0x1] %v3432_v25 }
0x181d   : > { %4486 = shalt.err (!%p4483_p7)
}
0x181e   : > { %s4487_s22 = scalar_lea.hbm %s5276_s29, 16  ;;  %s4491_s21 = scalar_lea.hbm %s5396_s24, 32 }
0x181f   : > { %p4488_p8 = scmp.ne.s32.totalorder %s5276_s29, %s4487_s22  ;;  %p4492_p1 = scmp.lt.u32.totalorder %s5276_s29, %s5396_s24 }
0x1820   : > { %p4493_p0 = scmp.lt.u32.totalorder %s4491_s21, %s4487_s22  ;;  %p4495_p6 = scmp.lt.u32.totalorder %s4487_s22, %s5276_s29 }
0x1821   : > { %p4489_p11 = pnand %p4488_p8, %p5397_p9 }
0x1822   : > { %p4494_p5 = por %p4493_p0, %p4492_p1 }
0x1823   : > { %p4490_p13 = pneg %p4489_p11 }
0x1824   : > { %p4496_p10 = por %p4495_p6, %p4494_p5 }
0x1826   : > { %p4497_p12 = pnand %p4496_p10, %p4490_p13 }
0x1828   : > { %4500 = shalt.err (!%p4497_p12)
}
0x1829   : > { %4226 = dma.vmem_to_hbm [thread:$0]  (%p5397_p9), %s5278_s25, 16, %s5276_s29, %s3437_s27  }
0x182a PF: > { %s5398_s18 = sld [smem:[#allocation10_spill]]  ;;  %s5399_s2 = sld [smem:[#allocation8_spill]] }
0x182b   : > { %s5400_s19 = sld [smem:[#allocation13_spill]] }
0x1830   : > { %p4238_p2 = scmp.ge.s32.totalorder %s5398_s18, 2  ;;  %s3461_s23 = sand.u32 1, %s5399_s2  }
0x1831   : > { %p5401_p3 = scmp.ne.s32.totalorder %s5400_s19, 0  ;;  %s3462_s0 = scalar_lea.sflag [#allocation4], %s3461_s23 }
0x1833   : > { %p4233_p4 = pnand %p4238_p2, %p5401_p3 }
0x1835   : > { %4522 = dma.done.wait (!%p4233_p4), %s3462_s0, 16  }
0x1836   : > { %4524 = vsyncadd (!%p4233_p4), %s3462_s0, 4294967280  ;;  %s5402_s21 = sld [smem:[#allocation11_spill]]  ;;  %s5403_s22 = sld [smem:[#allocation9_spill]] }
0x1837   : > { %s5404_s20 = sld [smem:[#allocation12_spill]]  ;;  %s5405_s0 = smov %s4531_s30 }
0x183c   : > { %p30_p7 = scmp.ge.s32.totalorder %s5402_s21, 4   ;;  %s5406_s30 = smov %s5403_s22 }
0x183e   :  { %32 = sbr.rel (!%p30_p7) target bundleno = 11 (0xb), region = 148 }
0x1845   :  { %3466 = vsyncpa [#allocation3], 1 }
0x1846   :  { %3468 = vsyncpa [#allocation3 + $0x1], 1 }
0x1847   :  { %3469 = vsyncpa [#allocation4], 1 }
0x1848   :  { %3471 = vsyncpa [#allocation4 + $0x1], 1 }

</bundles_post_ra>
